<compile_context>
chip_gen: v7x
topology: tpu7x:2x2x1
jax: 0.10.0
libtpu: 0.0.40
codegen_flags: <defaults>
</compile_context>

<pallas_src>
import jax
import jax.numpy as jnp
from jax.experimental import pallas as pl
from jax.experimental.pallas import tpu as pltpu

# ---- hyperparameters (small, consistent with the module structure) ----
VOCAB_SIZE = 32
N_EMBD = 32           # n_embd
BLOCK_SIZE = 8        # block_size == sequence length T
N_HEAD = 4            # n_head
HEAD_SIZE = N_EMBD // N_HEAD
N_LAYER = 2           # n_layer
FEED_FORWARD = 64     # feed_forward hidden dim of FeedFoward
N_HIDDEN = 32         # n_hidden
N_OUTPUT = 4          # n_output
BATCH = 2

_VMEM = pl.BlockSpec(memory_space=pltpu.MemorySpace.VMEM)


def _layer_norm(v, g, b, eps=1e-5):
    mu = jnp.mean(v, axis=-1, keepdims=True)
    var = jnp.mean((v - mu) ** 2, axis=-1, keepdims=True)
    return (v - mu) * jax.lax.rsqrt(var + eps) * g + b


def _softmax_last(x):
    m = jnp.max(x, axis=-1, keepdims=True)
    e = jnp.exp(x - m)
    s = jnp.sum(e, axis=-1, keepdims=True)
    # reciprocal on the EUP slot instead of a VALU divide
    return e * pl.reciprocal(s, approx=True)


def fused_classifier_kernel(
        x_ref,
        ln1g_ref, ln1b_ref, wq_ref, wk_ref, wv_ref, wp_ref, bp_ref,
        ln2g_ref, ln2b_ref, w1_ref, b1_ref, w2_ref, b2_ref,
        fc1w_ref, fc1b_ref, fc2w_ref, fc2b_ref,
        logits_ref, attn_ref):
    """Whole Classifier forward: N_LAYER transformer blocks + MLP head."""
    BT = BATCH * BLOCK_SIZE
    x = x_ref[...].astype(jnp.float32)                    # (B*T, C), f32
    scale = HEAD_SIZE ** -0.5

    for l in range(N_LAYER):                              # statically unrolled
        # ---------- multi-head self-attention on ln1(x), heads batched ----------
        h = _layer_norm(x, ln1g_ref[l], ln1b_ref[l])       # (B*T, C) f32
        hb = jnp.broadcast_to(h.astype(jnp.bfloat16),
                              (N_HEAD, BT, N_EMBD))        # (H, B*T, C) bf16

        # head-split weights: (H, C, D) -> batched matmul, no transposes needed
        q = jnp.einsum('hnc,hcd->hnd', hb, wq_ref[l],
                       preferred_element_type=jnp.float32)  # (H, B*T, D)
        k = jnp.einsum('hnc,hcd->hnd', hb, wk_ref[l],
                       preferred_element_type=jnp.float32)
        v = jnp.einsum('hnc,hcd->hnd', hb, wv_ref[l],
                       preferred_element_type=jnp.float32)

        # (H, B*T, D) -> (H*B, T, D): sublane-aligned reshape, no relayout
        qz = q.reshape(N_HEAD * BATCH, BLOCK_SIZE, HEAD_SIZE)
        kz = k.reshape(N_HEAD * BATCH, BLOCK_SIZE, HEAD_SIZE)
        vz = v.reshape(N_HEAD * BATCH, BLOCK_SIZE, HEAD_SIZE)

        wei = jnp.einsum('zqd,zkd->zqk', qz, kz,
                         preferred_element_type=jnp.float32) * scale
        wei = _softmax_last(wei)                           # (H*B, T, T) f32
        # decoding=False in the reference -> no causal mask

        # attention maps: rows ordered (head, batch) -> matches PyTorch append order
        attn_ref[pl.ds(l * N_HEAD, N_HEAD)] = wei.reshape(
            N_HEAD, BATCH, BLOCK_SIZE, BLOCK_SIZE)

        o = jnp.einsum('zqk,zkd->zqd', wei, vz,
                       preferred_element_type=jnp.float32)  # (H*B, T, D)
        o = o.reshape(N_HEAD, BT, HEAD_SIZE).astype(jnp.bfloat16)
        # output projection == concat(heads) @ Wp: per-head matmul then sum over heads
        sa = jnp.einsum('hnd,hdc->hnc', o, wp_ref[l],
                        preferred_element_type=jnp.float32).sum(axis=0)
        sa = sa + bp_ref[l]
        # TODO(synk): nn.Dropout(0.3) after attention proj / ffwd (dropout=True in
        # Encoder) is elided -> identity (eval-mode semantics) for determinism.
        x = x + sa

        # ---------- feed-forward on ln2(x) ----------
        h2 = _layer_norm(x, ln2g_ref[l], ln2b_ref[l])
        f = jnp.dot(h2.astype(jnp.bfloat16), w1_ref[l],
                    preferred_element_type=jnp.float32) + b1_ref[l]
        f = jnp.maximum(f, 0.0)
        f = jnp.dot(f.astype(jnp.bfloat16), w2_ref[l],
                    preferred_element_type=jnp.float32) + b2_ref[l]
        x = x + f

    # ---------- classifier head: mean over T -> fc1 -> ReLU -> fc2 ----------
    pooled = jnp.mean(x.reshape(BATCH, BLOCK_SIZE, N_EMBD), axis=1)   # (B, C)
    hc = jnp.dot(pooled.astype(jnp.bfloat16), fc1w_ref[...],
                 preferred_element_type=jnp.float32) + fc1b_ref[...]
    hc = jnp.maximum(hc, 0.0)
    logits_ref[...] = jnp.dot(hc.astype(jnp.bfloat16), fc2w_ref[...],
                              preferred_element_type=jnp.float32) + fc2b_ref[...]


def init_params(key):
    """Deterministic init mirroring Classifier._init_weights:
       Linear/Embedding weights ~ N(0, 0.02), biases = 0, LayerNorm = (1, 0).
       Weight matrices stored (in_features, out_features); QKV/proj stored
       head-split; matmul weights kept in bf16 (accumulation stays f32)."""
    def normal(k, shape, dtype=jnp.float32):
        return (jax.random.normal(k, shape, jnp.float32) * 0.02).astype(dtype)

    ks = iter(jax.random.split(key, 16))
    bf = jnp.bfloat16
    L, C, H, D, F = N_LAYER, N_EMBD, N_HEAD, HEAD_SIZE, FEED_FORWARD
    return {
        'tok_emb': normal(next(ks), (VOCAB_SIZE, C)),
        'pos_emb': normal(next(ks), (BLOCK_SIZE, C)),
        # transformer blocks (stacked along leading layer axis)
        'ln1_g': jnp.ones((L, 1, C), jnp.float32),
        'ln1_b': jnp.zeros((L, 1, C), jnp.float32),
        'wq': normal(next(ks), (L, H, C, D), bf),
        'wk': normal(next(ks), (L, H, C, D), bf),
        'wv': normal(next(ks), (L, H, C, D), bf),
        'wp': normal(next(ks), (L, H, D, C), bf),
        'bp': jnp.zeros((L, 1, C), jnp.float32),
        'ln2_g': jnp.ones((L, 1, C), jnp.float32),
        'ln2_b': jnp.zeros((L, 1, C), jnp.float32),
        'w1': normal(next(ks), (L, C, F), bf),
        'b1': jnp.zeros((L, 1, F), jnp.float32),
        'w2': normal(next(ks), (L, F, C), bf),
        'b2': jnp.zeros((L, 1, C), jnp.float32),
        # classifier head
        'fc1_w': normal(next(ks), (C, N_HIDDEN), bf),
        'fc1_b': jnp.zeros((1, N_HIDDEN), jnp.float32),
        'fc2_w': normal(next(ks), (N_HIDDEN, N_OUTPUT), bf),
        'fc2_b': jnp.zeros((1, N_OUTPUT), jnp.float32),
    }


@jax.jit
def classifier_forward(params, idx):
    """Mirrors Classifier.forward: returns (logits, attention_maps list)."""
    # Embedding gathers + positional add (glue, plain JAX under the same jit).
    tok_emb = params['tok_emb'][idx]                       # (B, T, C)
    x = (tok_emb + params['pos_emb'][None, :, :]).astype(jnp.float32)
    x = x.reshape(BATCH * BLOCK_SIZE, N_EMBD)              # (B*T, C)

    logits, attn = pl.pallas_call(
        fused_classifier_kernel,
        out_shape=(
            jax.ShapeDtypeStruct((BATCH, N_OUTPUT), jnp.float32),
            jax.ShapeDtypeStruct(
                (N_LAYER * N_HEAD, BATCH, BLOCK_SIZE, BLOCK_SIZE), jnp.float32),
        ),
        in_specs=[_VMEM] * 18,
        out_specs=(_VMEM, _VMEM),
    )(x,
      params['ln1_g'], params['ln1_b'],
      params['wq'], params['wk'], params['wv'], params['wp'], params['bp'],
      params['ln2_g'], params['ln2_b'],
      params['w1'], params['b1'], params['w2'], params['b2'],
      params['fc1_w'], params['fc1_b'], params['fc2_w'], params['fc2_b'])

    # PyTorch appends one (B, T, T) map per head, head order, per layer.
    attn_maps = [attn[i] for i in range(N_LAYER * N_HEAD)]
    return logits, attn_maps


if __name__ == "__main__":
    key = jax.random.PRNGKey(0)
    pkey, dkey = jax.random.split(key)
    params = init_params(pkey)

    idx = jax.random.randint(dkey, (BATCH, BLOCK_SIZE), 0, VOCAB_SIZE,
                             dtype=jnp.int32)

    logits, attn_maps = classifier_forward(params, idx)
    logits, attn_maps = jax.block_until_ready((logits, attn_maps))

    assert logits.shape == (BATCH, N_OUTPUT)
    assert len(attn_maps) == N_LAYER * N_HEAD
    assert all(a.shape == (BATCH, BLOCK_SIZE, BLOCK_SIZE) for a in attn_maps)
    assert bool(jnp.all(jnp.isfinite(logits)))
    print("KERNEL_OK")
</pallas_src>

<mosaic_0001>
module attributes {stable_mosaic.version = 11 : i64} {
  func.func @fused_classifier_kernel(%arg0: memref<16x32xf32, #tpu.memory_space<vmem>>, %arg1: memref<2x1x32xf32, #tpu.memory_space<vmem>>, %arg2: memref<2x1x32xf32, #tpu.memory_space<vmem>>, %arg3: memref<2x4x32x8xbf16, #tpu.memory_space<vmem>>, %arg4: memref<2x4x32x8xbf16, #tpu.memory_space<vmem>>, %arg5: memref<2x4x32x8xbf16, #tpu.memory_space<vmem>>, %arg6: memref<2x4x8x32xbf16, #tpu.memory_space<vmem>>, %arg7: memref<2x1x32xf32, #tpu.memory_space<vmem>>, %arg8: memref<2x1x32xf32, #tpu.memory_space<vmem>>, %arg9: memref<2x1x32xf32, #tpu.memory_space<vmem>>, %arg10: memref<2x32x64xbf16, #tpu.memory_space<vmem>>, %arg11: memref<2x1x64xf32, #tpu.memory_space<vmem>>, %arg12: memref<2x64x32xbf16, #tpu.memory_space<vmem>>, %arg13: memref<2x1x32xf32, #tpu.memory_space<vmem>>, %arg14: memref<32x32xbf16, #tpu.memory_space<vmem>>, %arg15: memref<1x32xf32, #tpu.memory_space<vmem>>, %arg16: memref<32x4xbf16, #tpu.memory_space<vmem>>, %arg17: memref<1x4xf32, #tpu.memory_space<vmem>>, %arg18: memref<2x4xf32, #tpu.memory_space<vmem>>, %arg19: memref<8x2x8x8xf32, #tpu.memory_space<vmem>>) attributes {dimension_semantics = [], scalar_prefetch = 0 : i64, scratch_operands = 0 : i64, tpu.core_type = #tpu.core_type<tc>} {
    %c0 = arith.constant 0 : index
    %c0_0 = arith.constant 0 : index
    %0 = vector.load %arg0[%c0, %c0_0] : memref<16x32xf32, #tpu.memory_space<vmem>>, vector<16x32xf32>
    %c0_1 = arith.constant 0 : index
    %c0_2 = arith.constant 0 : index
    %c0_3 = arith.constant 0 : index
    %1 = vector.load %arg1[%c0_1, %c0_2, %c0_3] : memref<2x1x32xf32, #tpu.memory_space<vmem>>, vector<1x1x32xf32>
    %2 = vector.shape_cast %1 : vector<1x1x32xf32> to vector<1x32xf32>
    %c0_4 = arith.constant 0 : index
    %c0_5 = arith.constant 0 : index
    %c0_6 = arith.constant 0 : index
    %3 = vector.load %arg2[%c0_4, %c0_5, %c0_6] : memref<2x1x32xf32, #tpu.memory_space<vmem>>, vector<1x1x32xf32>
    %4 = vector.shape_cast %3 : vector<1x1x32xf32> to vector<1x32xf32>
    %cst = arith.constant dense<0.000000e+00> : vector<16xf32>
    %5 = vector.multi_reduction <add>, %0, %cst [1] : vector<16x32xf32> to vector<16xf32>
    %6 = vector.shape_cast %5 : vector<16xf32> to vector<16x1xf32>
    %cst_7 = arith.constant 3.200000e+01 : f32
    %7 = vector.broadcast %cst_7 : f32 to vector<16x1xf32>
    %8 = arith.divf %6, %7 : vector<16x1xf32>
    %9 = vector.broadcast %8 : vector<16x1xf32> to vector<16x32xf32>
    %10 = arith.subf %0, %9 : vector<16x32xf32>
    %11 = arith.mulf %10, %10 : vector<16x32xf32>
    %cst_8 = arith.constant dense<0.000000e+00> : vector<16xf32>
    %12 = vector.multi_reduction <add>, %11, %cst_8 [1] : vector<16x32xf32> to vector<16xf32>
    %13 = vector.shape_cast %12 : vector<16xf32> to vector<16x1xf32>
    %cst_9 = arith.constant 3.200000e+01 : f32
    %14 = vector.broadcast %cst_9 : f32 to vector<16x1xf32>
    %15 = arith.divf %13, %14 : vector<16x1xf32>
    %16 = vector.broadcast %8 : vector<16x1xf32> to vector<16x32xf32>
    %17 = arith.subf %0, %16 : vector<16x32xf32>
    %cst_10 = arith.constant 9.99999974E-6 : f32
    %18 = vector.broadcast %cst_10 : f32 to vector<16x1xf32>
    %19 = arith.addf %15, %18 : vector<16x1xf32>
    %20 = math.rsqrt %19 : vector<16x1xf32>
    %21 = vector.broadcast %20 : vector<16x1xf32> to vector<16x32xf32>
    %22 = arith.mulf %17, %21 : vector<16x32xf32>
    %23 = vector.broadcast %2 : vector<1x32xf32> to vector<16x32xf32>
    %24 = arith.mulf %22, %23 : vector<16x32xf32>
    %25 = vector.broadcast %4 : vector<1x32xf32> to vector<16x32xf32>
    %26 = arith.addf %24, %25 : vector<16x32xf32>
    %27 = arith.truncf %26 : vector<16x32xf32> to vector<16x32xbf16>
    %28 = vector.shape_cast %27 : vector<16x32xbf16> to vector<1x16x32xbf16>
    %29 = vector.broadcast %28 : vector<1x16x32xbf16> to vector<4x16x32xbf16>
    %c0_11 = arith.constant 0 : index
    %c0_12 = arith.constant 0 : index
    %c0_13 = arith.constant 0 : index
    %c0_14 = arith.constant 0 : index
    %30 = vector.load %arg3[%c0_11, %c0_12, %c0_13, %c0_14] : memref<2x4x32x8xbf16, #tpu.memory_space<vmem>>, vector<1x4x32x8xbf16>
    %31 = vector.shape_cast %30 : vector<1x4x32x8xbf16> to vector<4x32x8xbf16>
    "tpu.trace_start"() <{level = 10 : i32, message = "hnc,hcd->hnd"}> : () -> ()
    %cst_15 = arith.constant dense<0.000000e+00> : vector<4x16x8xf32>
    %32 = tpu.matmul %29, %31, %cst_15 {dimension_numbers = #tpu.dot_dimension_numbers<[2], [1], [1], [2], [0, 0, 0, 1, 1, 2], [0], [0]>} : vector<4x16x32xbf16>, vector<4x32x8xbf16>, vector<4x16x8xf32> -> vector<4x16x8xf32>
    "tpu.trace_stop"() : () -> ()
    %c0_16 = arith.constant 0 : index
    %c0_17 = arith.constant 0 : index
    %c0_18 = arith.constant 0 : index
    %c0_19 = arith.constant 0 : index
    %33 = vector.load %arg4[%c0_16, %c0_17, %c0_18, %c0_19] : memref<2x4x32x8xbf16, #tpu.memory_space<vmem>>, vector<1x4x32x8xbf16>
    %34 = vector.shape_cast %33 : vector<1x4x32x8xbf16> to vector<4x32x8xbf16>
    "tpu.trace_start"() <{level = 10 : i32, message = "hnc,hcd->hnd"}> : () -> ()
    %cst_20 = arith.constant dense<0.000000e+00> : vector<4x16x8xf32>
    %35 = tpu.matmul %29, %34, %cst_20 {dimension_numbers = #tpu.dot_dimension_numbers<[2], [1], [1], [2], [0, 0, 0, 1, 1, 2], [0], [0]>} : vector<4x16x32xbf16>, vector<4x32x8xbf16>, vector<4x16x8xf32> -> vector<4x16x8xf32>
    "tpu.trace_stop"() : () -> ()
    %c0_21 = arith.constant 0 : index
    %c0_22 = arith.constant 0 : index
    %c0_23 = arith.constant 0 : index
    %c0_24 = arith.constant 0 : index
    %36 = vector.load %arg5[%c0_21, %c0_22, %c0_23, %c0_24] : memref<2x4x32x8xbf16, #tpu.memory_space<vmem>>, vector<1x4x32x8xbf16>
    %37 = vector.shape_cast %36 : vector<1x4x32x8xbf16> to vector<4x32x8xbf16>
    "tpu.trace_start"() <{level = 10 : i32, message = "hnc,hcd->hnd"}> : () -> ()
    %cst_25 = arith.constant dense<0.000000e+00> : vector<4x16x8xf32>
    %38 = tpu.matmul %29, %37, %cst_25 {dimension_numbers = #tpu.dot_dimension_numbers<[2], [1], [1], [2], [0, 0, 0, 1, 1, 2], [0], [0]>} : vector<4x16x32xbf16>, vector<4x32x8xbf16>, vector<4x16x8xf32> -> vector<4x16x8xf32>
    "tpu.trace_stop"() : () -> ()
    %39 = vector.shape_cast %32 : vector<4x16x8xf32> to vector<8x8x8xf32>
    %40 = vector.shape_cast %35 : vector<4x16x8xf32> to vector<8x8x8xf32>
    %41 = vector.shape_cast %38 : vector<4x16x8xf32> to vector<8x8x8xf32>
    "tpu.trace_start"() <{level = 10 : i32, message = "zqd,zkd->zqk"}> : () -> ()
    %cst_26 = arith.constant dense<0.000000e+00> : vector<8x8x8xf32>
    %42 = tpu.matmul %39, %40, %cst_26 {dimension_numbers = #tpu.dot_dimension_numbers<[2], [2], [1], [1], [0, 0, 0, 1, 1, 1], [0], [0]>} : vector<8x8x8xf32>, vector<8x8x8xf32>, vector<8x8x8xf32> -> vector<8x8x8xf32>
    "tpu.trace_stop"() : () -> ()
    %cst_27 = arith.constant 0.353553385 : f32
    %43 = vector.broadcast %cst_27 : f32 to vector<8x8x8xf32>
    %44 = arith.mulf %42, %43 : vector<8x8x8xf32>
    %cst_28 = arith.constant dense<0xFF800000> : vector<8x8xf32>
    %45 = vector.multi_reduction <maximumf>, %44, %cst_28 [2] : vector<8x8x8xf32> to vector<8x8xf32>
    %46 = vector.shape_cast %45 : vector<8x8xf32> to vector<8x8x1xf32>
    %47 = vector.broadcast %46 : vector<8x8x1xf32> to vector<8x8x8xf32>
    %48 = arith.subf %44, %47 : vector<8x8x8xf32>
    %49 = math.exp %48 : vector<8x8x8xf32>
    %cst_29 = arith.constant dense<0.000000e+00> : vector<8x8xf32>
    %50 = vector.multi_reduction <add>, %49, %cst_29 [2] : vector<8x8x8xf32> to vector<8x8xf32>
    %51 = vector.shape_cast %50 : vector<8x8xf32> to vector<8x8x1xf32>
    %52 = tpu.reciprocal %51 {approx = true} : vector<8x8x1xf32> -> vector<8x8x1xf32>
    %53 = vector.broadcast %52 : vector<8x8x1xf32> to vector<8x8x8xf32>
    %54 = arith.mulf %49, %53 : vector<8x8x8xf32>
    %55 = vector.shape_cast %54 : vector<8x8x8xf32> to vector<4x2x8x8xf32>
    %c0_30 = arith.constant 0 : index
    %c0_31 = arith.constant 0 : index
    %c0_32 = arith.constant 0 : index
    %c0_33 = arith.constant 0 : index
    %56 = vector.load %arg19[%c0_30, %c0_31, %c0_32, %c0_33] : memref<8x2x8x8xf32, #tpu.memory_space<vmem>>, vector<4x2x8x8xf32>
    tpu.vector_store %arg19[%c0_30, %c0_31, %c0_32, %c0_33], %55 {strides = array<i32>} : memref<8x2x8x8xf32, #tpu.memory_space<vmem>>, vector<4x2x8x8xf32>,
    "tpu.trace_start"() <{level = 10 : i32, message = "zqk,zkd->zqd"}> : () -> ()
    %cst_34 = arith.constant dense<0.000000e+00> : vector<8x8x8xf32>
    %57 = tpu.matmul %54, %41, %cst_34 {dimension_numbers = #tpu.dot_dimension_numbers<[2], [1], [1], [2], [0, 0, 0, 1, 1, 2], [0], [0]>} : vector<8x8x8xf32>, vector<8x8x8xf32>, vector<8x8x8xf32> -> vector<8x8x8xf32>
    "tpu.trace_stop"() : () -> ()
    %58 = vector.shape_cast %57 : vector<8x8x8xf32> to vector<4x16x8xf32>
    %59 = arith.truncf %58 : vector<4x16x8xf32> to vector<4x16x8xbf16>
    %c0_35 = arith.constant 0 : index
    %c0_36 = arith.constant 0 : index
    %c0_37 = arith.constant 0 : index
    %c0_38 = arith.constant 0 : index
    %60 = vector.load %arg6[%c0_35, %c0_36, %c0_37, %c0_38] : memref<2x4x8x32xbf16, #tpu.memory_space<vmem>>, vector<1x4x8x32xbf16>
    %61 = vector.shape_cast %60 : vector<1x4x8x32xbf16> to vector<4x8x32xbf16>
    "tpu.trace_start"() <{level = 10 : i32, message = "hnd,hdc->hnc"}> : () -> ()
    %cst_39 = arith.constant dense<0.000000e+00> : vector<4x16x32xf32>
    %62 = tpu.matmul %59, %61, %cst_39 {dimension_numbers = #tpu.dot_dimension_numbers<[2], [1], [1], [2], [0, 0, 0, 1, 1, 2], [0], [0]>} : vector<4x16x8xbf16>, vector<4x8x32xbf16>, vector<4x16x32xf32> -> vector<4x16x32xf32>
    "tpu.trace_stop"() : () -> ()
    %cst_40 = arith.constant dense<0.000000e+00> : vector<16x32xf32>
    %63 = vector.multi_reduction <add>, %62, %cst_40 [0] : vector<4x16x32xf32> to vector<16x32xf32>
    %c0_41 = arith.constant 0 : index
    %c0_42 = arith.constant 0 : index
    %c0_43 = arith.constant 0 : index
    %64 = vector.load %arg7[%c0_41, %c0_42, %c0_43] : memref<2x1x32xf32, #tpu.memory_space<vmem>>, vector<1x1x32xf32>
    %65 = vector.shape_cast %64 : vector<1x1x32xf32> to vector<1x32xf32>
    %66 = vector.broadcast %65 : vector<1x32xf32> to vector<16x32xf32>
    %67 = arith.addf %63, %66 : vector<16x32xf32>
    %68 = arith.addf %0, %67 : vector<16x32xf32>
    %c0_44 = arith.constant 0 : index
    %c0_45 = arith.constant 0 : index
    %c0_46 = arith.constant 0 : index
    %69 = vector.load %arg8[%c0_44, %c0_45, %c0_46] : memref<2x1x32xf32, #tpu.memory_space<vmem>>, vector<1x1x32xf32>
    %70 = vector.shape_cast %69 : vector<1x1x32xf32> to vector<1x32xf32>
    %c0_47 = arith.constant 0 : index
    %c0_48 = arith.constant 0 : index
    %c0_49 = arith.constant 0 : index
    %71 = vector.load %arg9[%c0_47, %c0_48, %c0_49] : memref<2x1x32xf32, #tpu.memory_space<vmem>>, vector<1x1x32xf32>
    %72 = vector.shape_cast %71 : vector<1x1x32xf32> to vector<1x32xf32>
    %cst_50 = arith.constant dense<0.000000e+00> : vector<16xf32>
    %73 = vector.multi_reduction <add>, %68, %cst_50 [1] : vector<16x32xf32> to vector<16xf32>
    %74 = vector.shape_cast %73 : vector<16xf32> to vector<16x1xf32>
    %cst_51 = arith.constant 3.200000e+01 : f32
    %75 = vector.broadcast %cst_51 : f32 to vector<16x1xf32>
    %76 = arith.divf %74, %75 : vector<16x1xf32>
    %77 = vector.broadcast %76 : vector<16x1xf32> to vector<16x32xf32>
    %78 = arith.subf %68, %77 : vector<16x32xf32>
    %79 = arith.mulf %78, %78 : vector<16x32xf32>
    %cst_52 = arith.constant dense<0.000000e+00> : vector<16xf32>
    %80 = vector.multi_reduction <add>, %79, %cst_52 [1] : vector<16x32xf32> to vector<16xf32>
    %81 = vector.shape_cast %80 : vector<16xf32> to vector<16x1xf32>
    %cst_53 = arith.constant 3.200000e+01 : f32
    %82 = vector.broadcast %cst_53 : f32 to vector<16x1xf32>
    %83 = arith.divf %81, %82 : vector<16x1xf32>
    %84 = vector.broadcast %76 : vector<16x1xf32> to vector<16x32xf32>
    %85 = arith.subf %68, %84 : vector<16x32xf32>
    %cst_54 = arith.constant 9.99999974E-6 : f32
    %86 = vector.broadcast %cst_54 : f32 to vector<16x1xf32>
    %87 = arith.addf %83, %86 : vector<16x1xf32>
    %88 = math.rsqrt %87 : vector<16x1xf32>
    %89 = vector.broadcast %88 : vector<16x1xf32> to vector<16x32xf32>
    %90 = arith.mulf %85, %89 : vector<16x32xf32>
    %91 = vector.broadcast %70 : vector<1x32xf32> to vector<16x32xf32>
    %92 = arith.mulf %90, %91 : vector<16x32xf32>
    %93 = vector.broadcast %72 : vector<1x32xf32> to vector<16x32xf32>
    %94 = arith.addf %92, %93 : vector<16x32xf32>
    %95 = arith.truncf %94 : vector<16x32xf32> to vector<16x32xbf16>
    %c0_55 = arith.constant 0 : index
    %c0_56 = arith.constant 0 : index
    %c0_57 = arith.constant 0 : index
    %96 = vector.load %arg10[%c0_55, %c0_56, %c0_57] : memref<2x32x64xbf16, #tpu.memory_space<vmem>>, vector<1x32x64xbf16>
    %97 = vector.shape_cast %96 : vector<1x32x64xbf16> to vector<32x64xbf16>
    %cst_58 = arith.constant dense<0.000000e+00> : vector<16x64xf32>
    %98 = tpu.matmul %95, %97, %cst_58 {dimension_numbers = #tpu.dot_dimension_numbers<[1], [0], [0], [1], [0, 0, 1, 1], [], []>} : vector<16x32xbf16>, vector<32x64xbf16>, vector<16x64xf32> -> vector<16x64xf32>
    %c0_59 = arith.constant 0 : index
    %c0_60 = arith.constant 0 : index
    %c0_61 = arith.constant 0 : index
    %99 = vector.load %arg11[%c0_59, %c0_60, %c0_61] : memref<2x1x64xf32, #tpu.memory_space<vmem>>, vector<1x1x64xf32>
    %100 = vector.shape_cast %99 : vector<1x1x64xf32> to vector<1x64xf32>
    %101 = vector.broadcast %100 : vector<1x64xf32> to vector<16x64xf32>
    %102 = arith.addf %98, %101 : vector<16x64xf32>
    %cst_62 = arith.constant 0.000000e+00 : f32
    %103 = vector.broadcast %cst_62 : f32 to vector<16x64xf32>
    %104 = arith.maximumf %102, %103 : vector<16x64xf32>
    %105 = arith.truncf %104 : vector<16x64xf32> to vector<16x64xbf16>
    %c0_63 = arith.constant 0 : index
    %c0_64 = arith.constant 0 : index
    %c0_65 = arith.constant 0 : index
    %106 = vector.load %arg12[%c0_63, %c0_64, %c0_65] : memref<2x64x32xbf16, #tpu.memory_space<vmem>>, vector<1x64x32xbf16>
    %107 = vector.shape_cast %106 : vector<1x64x32xbf16> to vector<64x32xbf16>
    %cst_66 = arith.constant dense<0.000000e+00> : vector<16x32xf32>
    %108 = tpu.matmul %105, %107, %cst_66 {dimension_numbers = #tpu.dot_dimension_numbers<[1], [0], [0], [1], [0, 0, 1, 1], [], []>} : vector<16x64xbf16>, vector<64x32xbf16>, vector<16x32xf32> -> vector<16x32xf32>
    %c0_67 = arith.constant 0 : index
    %c0_68 = arith.constant 0 : index
    %c0_69 = arith.constant 0 : index
    %109 = vector.load %arg13[%c0_67, %c0_68, %c0_69] : memref<2x1x32xf32, #tpu.memory_space<vmem>>, vector<1x1x32xf32>
    %110 = vector.shape_cast %109 : vector<1x1x32xf32> to vector<1x32xf32>
    %111 = vector.broadcast %110 : vector<1x32xf32> to vector<16x32xf32>
    %112 = arith.addf %108, %111 : vector<16x32xf32>
    %113 = arith.addf %68, %112 : vector<16x32xf32>
    %c1 = arith.constant 1 : index
    %c0_70 = arith.constant 0 : index
    %c0_71 = arith.constant 0 : index
    %114 = vector.load %arg1[%c1, %c0_70, %c0_71] : memref<2x1x32xf32, #tpu.memory_space<vmem>>, vector<1x1x32xf32>
    %115 = vector.shape_cast %114 : vector<1x1x32xf32> to vector<1x32xf32>
    %c1_72 = arith.constant 1 : index
    %c0_73 = arith.constant 0 : index
    %c0_74 = arith.constant 0 : index
    %116 = vector.load %arg2[%c1_72, %c0_73, %c0_74] : memref<2x1x32xf32, #tpu.memory_space<vmem>>, vector<1x1x32xf32>
    %117 = vector.shape_cast %116 : vector<1x1x32xf32> to vector<1x32xf32>
    %cst_75 = arith.constant dense<0.000000e+00> : vector<16xf32>
    %118 = vector.multi_reduction <add>, %113, %cst_75 [1] : vector<16x32xf32> to vector<16xf32>
    %119 = vector.shape_cast %118 : vector<16xf32> to vector<16x1xf32>
    %cst_76 = arith.constant 3.200000e+01 : f32
    %120 = vector.broadcast %cst_76 : f32 to vector<16x1xf32>
    %121 = arith.divf %119, %120 : vector<16x1xf32>
    %122 = vector.broadcast %121 : vector<16x1xf32> to vector<16x32xf32>
    %123 = arith.subf %113, %122 : vector<16x32xf32>
    %124 = arith.mulf %123, %123 : vector<16x32xf32>
    %cst_77 = arith.constant dense<0.000000e+00> : vector<16xf32>
    %125 = vector.multi_reduction <add>, %124, %cst_77 [1] : vector<16x32xf32> to vector<16xf32>
    %126 = vector.shape_cast %125 : vector<16xf32> to vector<16x1xf32>
    %cst_78 = arith.constant 3.200000e+01 : f32
    %127 = vector.broadcast %cst_78 : f32 to vector<16x1xf32>
    %128 = arith.divf %126, %127 : vector<16x1xf32>
    %129 = vector.broadcast %121 : vector<16x1xf32> to vector<16x32xf32>
    %130 = arith.subf %113, %129 : vector<16x32xf32>
    %cst_79 = arith.constant 9.99999974E-6 : f32
    %131 = vector.broadcast %cst_79 : f32 to vector<16x1xf32>
    %132 = arith.addf %128, %131 : vector<16x1xf32>
    %133 = math.rsqrt %132 : vector<16x1xf32>
    %134 = vector.broadcast %133 : vector<16x1xf32> to vector<16x32xf32>
    %135 = arith.mulf %130, %134 : vector<16x32xf32>
    %136 = vector.broadcast %115 : vector<1x32xf32> to vector<16x32xf32>
    %137 = arith.mulf %135, %136 : vector<16x32xf32>
    %138 = vector.broadcast %117 : vector<1x32xf32> to vector<16x32xf32>
    %139 = arith.addf %137, %138 : vector<16x32xf32>
    %140 = arith.truncf %139 : vector<16x32xf32> to vector<16x32xbf16>
    %141 = vector.shape_cast %140 : vector<16x32xbf16> to vector<1x16x32xbf16>
    %142 = vector.broadcast %141 : vector<1x16x32xbf16> to vector<4x16x32xbf16>
    %c1_80 = arith.constant 1 : index
    %c0_81 = arith.constant 0 : index
    %c0_82 = arith.constant 0 : index
    %c0_83 = arith.constant 0 : index
    %143 = vector.load %arg3[%c1_80, %c0_81, %c0_82, %c0_83] : memref<2x4x32x8xbf16, #tpu.memory_space<vmem>>, vector<1x4x32x8xbf16>
    %144 = vector.shape_cast %143 : vector<1x4x32x8xbf16> to vector<4x32x8xbf16>
    "tpu.trace_start"() <{level = 10 : i32, message = "hnc,hcd->hnd"}> : () -> ()
    %cst_84 = arith.constant dense<0.000000e+00> : vector<4x16x8xf32>
    %145 = tpu.matmul %142, %144, %cst_84 {dimension_numbers = #tpu.dot_dimension_numbers<[2], [1], [1], [2], [0, 0, 0, 1, 1, 2], [0], [0]>} : vector<4x16x32xbf16>, vector<4x32x8xbf16>, vector<4x16x8xf32> -> vector<4x16x8xf32>
    "tpu.trace_stop"() : () -> ()
    %c1_85 = arith.constant 1 : index
    %c0_86 = arith.constant 0 : index
    %c0_87 = arith.constant 0 : index
    %c0_88 = arith.constant 0 : index
    %146 = vector.load %arg4[%c1_85, %c0_86, %c0_87, %c0_88] : memref<2x4x32x8xbf16, #tpu.memory_space<vmem>>, vector<1x4x32x8xbf16>
    %147 = vector.shape_cast %146 : vector<1x4x32x8xbf16> to vector<4x32x8xbf16>
    "tpu.trace_start"() <{level = 10 : i32, message = "hnc,hcd->hnd"}> : () -> ()
    %cst_89 = arith.constant dense<0.000000e+00> : vector<4x16x8xf32>
    %148 = tpu.matmul %142, %147, %cst_89 {dimension_numbers = #tpu.dot_dimension_numbers<[2], [1], [1], [2], [0, 0, 0, 1, 1, 2], [0], [0]>} : vector<4x16x32xbf16>, vector<4x32x8xbf16>, vector<4x16x8xf32> -> vector<4x16x8xf32>
    "tpu.trace_stop"() : () -> ()
    %c1_90 = arith.constant 1 : index
    %c0_91 = arith.constant 0 : index
    %c0_92 = arith.constant 0 : index
    %c0_93 = arith.constant 0 : index
    %149 = vector.load %arg5[%c1_90, %c0_91, %c0_92, %c0_93] : memref<2x4x32x8xbf16, #tpu.memory_space<vmem>>, vector<1x4x32x8xbf16>
    %150 = vector.shape_cast %149 : vector<1x4x32x8xbf16> to vector<4x32x8xbf16>
    "tpu.trace_start"() <{level = 10 : i32, message = "hnc,hcd->hnd"}> : () -> ()
    %cst_94 = arith.constant dense<0.000000e+00> : vector<4x16x8xf32>
    %151 = tpu.matmul %142, %150, %cst_94 {dimension_numbers = #tpu.dot_dimension_numbers<[2], [1], [1], [2], [0, 0, 0, 1, 1, 2], [0], [0]>} : vector<4x16x32xbf16>, vector<4x32x8xbf16>, vector<4x16x8xf32> -> vector<4x16x8xf32>
    "tpu.trace_stop"() : () -> ()
    %152 = vector.shape_cast %145 : vector<4x16x8xf32> to vector<8x8x8xf32>
    %153 = vector.shape_cast %148 : vector<4x16x8xf32> to vector<8x8x8xf32>
    %154 = vector.shape_cast %151 : vector<4x16x8xf32> to vector<8x8x8xf32>
    "tpu.trace_start"() <{level = 10 : i32, message = "zqd,zkd->zqk"}> : () -> ()
    %cst_95 = arith.constant dense<0.000000e+00> : vector<8x8x8xf32>
    %155 = tpu.matmul %152, %153, %cst_95 {dimension_numbers = #tpu.dot_dimension_numbers<[2], [2], [1], [1], [0, 0, 0, 1, 1, 1], [0], [0]>} : vector<8x8x8xf32>, vector<8x8x8xf32>, vector<8x8x8xf32> -> vector<8x8x8xf32>
    "tpu.trace_stop"() : () -> ()
    %cst_96 = arith.constant 0.353553385 : f32
    %156 = vector.broadcast %cst_96 : f32 to vector<8x8x8xf32>
    %157 = arith.mulf %155, %156 : vector<8x8x8xf32>
    %cst_97 = arith.constant dense<0xFF800000> : vector<8x8xf32>
    %158 = vector.multi_reduction <maximumf>, %157, %cst_97 [2] : vector<8x8x8xf32> to vector<8x8xf32>
    %159 = vector.shape_cast %158 : vector<8x8xf32> to vector<8x8x1xf32>
    %160 = vector.broadcast %159 : vector<8x8x1xf32> to vector<8x8x8xf32>
    %161 = arith.subf %157, %160 : vector<8x8x8xf32>
    %162 = math.exp %161 : vector<8x8x8xf32>
    %cst_98 = arith.constant dense<0.000000e+00> : vector<8x8xf32>
    %163 = vector.multi_reduction <add>, %162, %cst_98 [2] : vector<8x8x8xf32> to vector<8x8xf32>
    %164 = vector.shape_cast %163 : vector<8x8xf32> to vector<8x8x1xf32>
    %165 = tpu.reciprocal %164 {approx = true} : vector<8x8x1xf32> -> vector<8x8x1xf32>
    %166 = vector.broadcast %165 : vector<8x8x1xf32> to vector<8x8x8xf32>
    %167 = arith.mulf %162, %166 : vector<8x8x8xf32>
    %168 = vector.shape_cast %167 : vector<8x8x8xf32> to vector<4x2x8x8xf32>
    %c4 = arith.constant 4 : index
    %c0_99 = arith.constant 0 : index
    %c0_100 = arith.constant 0 : index
    %c0_101 = arith.constant 0 : index
    %169 = vector.load %arg19[%c4, %c0_99, %c0_100, %c0_101] : memref<8x2x8x8xf32, #tpu.memory_space<vmem>>, vector<4x2x8x8xf32>
    tpu.vector_store %arg19[%c4, %c0_99, %c0_100, %c0_101], %168 {strides = array<i32>} : memref<8x2x8x8xf32, #tpu.memory_space<vmem>>, vector<4x2x8x8xf32>,
    "tpu.trace_start"() <{level = 10 : i32, message = "zqk,zkd->zqd"}> : () -> ()
    %cst_102 = arith.constant dense<0.000000e+00> : vector<8x8x8xf32>
    %170 = tpu.matmul %167, %154, %cst_102 {dimension_numbers = #tpu.dot_dimension_numbers<[2], [1], [1], [2], [0, 0, 0, 1, 1, 2], [0], [0]>} : vector<8x8x8xf32>, vector<8x8x8xf32>, vector<8x8x8xf32> -> vector<8x8x8xf32>
    "tpu.trace_stop"() : () -> ()
    %171 = vector.shape_cast %170 : vector<8x8x8xf32> to vector<4x16x8xf32>
    %172 = arith.truncf %171 : vector<4x16x8xf32> to vector<4x16x8xbf16>
    %c1_103 = arith.constant 1 : index
    %c0_104 = arith.constant 0 : index
    %c0_105 = arith.constant 0 : index
    %c0_106 = arith.constant 0 : index
    %173 = vector.load %arg6[%c1_103, %c0_104, %c0_105, %c0_106] : memref<2x4x8x32xbf16, #tpu.memory_space<vmem>>, vector<1x4x8x32xbf16>
    %174 = vector.shape_cast %173 : vector<1x4x8x32xbf16> to vector<4x8x32xbf16>
    "tpu.trace_start"() <{level = 10 : i32, message = "hnd,hdc->hnc"}> : () -> ()
    %cst_107 = arith.constant dense<0.000000e+00> : vector<4x16x32xf32>
    %175 = tpu.matmul %172, %174, %cst_107 {dimension_numbers = #tpu.dot_dimension_numbers<[2], [1], [1], [2], [0, 0, 0, 1, 1, 2], [0], [0]>} : vector<4x16x8xbf16>, vector<4x8x32xbf16>, vector<4x16x32xf32> -> vector<4x16x32xf32>
    "tpu.trace_stop"() : () -> ()
    %cst_108 = arith.constant dense<0.000000e+00> : vector<16x32xf32>
    %176 = vector.multi_reduction <add>, %175, %cst_108 [0] : vector<4x16x32xf32> to vector<16x32xf32>
    %c1_109 = arith.constant 1 : index
    %c0_110 = arith.constant 0 : index
    %c0_111 = arith.constant 0 : index
    %177 = vector.load %arg7[%c1_109, %c0_110, %c0_111] : memref<2x1x32xf32, #tpu.memory_space<vmem>>, vector<1x1x32xf32>
    %178 = vector.shape_cast %177 : vector<1x1x32xf32> to vector<1x32xf32>
    %179 = vector.broadcast %178 : vector<1x32xf32> to vector<16x32xf32>
    %180 = arith.addf %176, %179 : vector<16x32xf32>
    %181 = arith.addf %113, %180 : vector<16x32xf32>
    %c1_112 = arith.constant 1 : index
    %c0_113 = arith.constant 0 : index
    %c0_114 = arith.constant 0 : index
    %182 = vector.load %arg8[%c1_112, %c0_113, %c0_114] : memref<2x1x32xf32, #tpu.memory_space<vmem>>, vector<1x1x32xf32>
    %183 = vector.shape_cast %182 : vector<1x1x32xf32> to vector<1x32xf32>
    %c1_115 = arith.constant 1 : index
    %c0_116 = arith.constant 0 : index
    %c0_117 = arith.constant 0 : index
    %184 = vector.load %arg9[%c1_115, %c0_116, %c0_117] : memref<2x1x32xf32, #tpu.memory_space<vmem>>, vector<1x1x32xf32>
    %185 = vector.shape_cast %184 : vector<1x1x32xf32> to vector<1x32xf32>
    %cst_118 = arith.constant dense<0.000000e+00> : vector<16xf32>
    %186 = vector.multi_reduction <add>, %181, %cst_118 [1] : vector<16x32xf32> to vector<16xf32>
    %187 = vector.shape_cast %186 : vector<16xf32> to vector<16x1xf32>
    %cst_119 = arith.constant 3.200000e+01 : f32
    %188 = vector.broadcast %cst_119 : f32 to vector<16x1xf32>
    %189 = arith.divf %187, %188 : vector<16x1xf32>
    %190 = vector.broadcast %189 : vector<16x1xf32> to vector<16x32xf32>
    %191 = arith.subf %181, %190 : vector<16x32xf32>
    %192 = arith.mulf %191, %191 : vector<16x32xf32>
    %cst_120 = arith.constant dense<0.000000e+00> : vector<16xf32>
    %193 = vector.multi_reduction <add>, %192, %cst_120 [1] : vector<16x32xf32> to vector<16xf32>
    %194 = vector.shape_cast %193 : vector<16xf32> to vector<16x1xf32>
    %cst_121 = arith.constant 3.200000e+01 : f32
    %195 = vector.broadcast %cst_121 : f32 to vector<16x1xf32>
    %196 = arith.divf %194, %195 : vector<16x1xf32>
    %197 = vector.broadcast %189 : vector<16x1xf32> to vector<16x32xf32>
    %198 = arith.subf %181, %197 : vector<16x32xf32>
    %cst_122 = arith.constant 9.99999974E-6 : f32
    %199 = vector.broadcast %cst_122 : f32 to vector<16x1xf32>
    %200 = arith.addf %196, %199 : vector<16x1xf32>
    %201 = math.rsqrt %200 : vector<16x1xf32>
    %202 = vector.broadcast %201 : vector<16x1xf32> to vector<16x32xf32>
    %203 = arith.mulf %198, %202 : vector<16x32xf32>
    %204 = vector.broadcast %183 : vector<1x32xf32> to vector<16x32xf32>
    %205 = arith.mulf %203, %204 : vector<16x32xf32>
    %206 = vector.broadcast %185 : vector<1x32xf32> to vector<16x32xf32>
    %207 = arith.addf %205, %206 : vector<16x32xf32>
    %208 = arith.truncf %207 : vector<16x32xf32> to vector<16x32xbf16>
    %c1_123 = arith.constant 1 : index
    %c0_124 = arith.constant 0 : index
    %c0_125 = arith.constant 0 : index
    %209 = vector.load %arg10[%c1_123, %c0_124, %c0_125] : memref<2x32x64xbf16, #tpu.memory_space<vmem>>, vector<1x32x64xbf16>
    %210 = vector.shape_cast %209 : vector<1x32x64xbf16> to vector<32x64xbf16>
    %cst_126 = arith.constant dense<0.000000e+00> : vector<16x64xf32>
    %211 = tpu.matmul %208, %210, %cst_126 {dimension_numbers = #tpu.dot_dimension_numbers<[1], [0], [0], [1], [0, 0, 1, 1], [], []>} : vector<16x32xbf16>, vector<32x64xbf16>, vector<16x64xf32> -> vector<16x64xf32>
    %c1_127 = arith.constant 1 : index
    %c0_128 = arith.constant 0 : index
    %c0_129 = arith.constant 0 : index
    %212 = vector.load %arg11[%c1_127, %c0_128, %c0_129] : memref<2x1x64xf32, #tpu.memory_space<vmem>>, vector<1x1x64xf32>
    %213 = vector.shape_cast %212 : vector<1x1x64xf32> to vector<1x64xf32>
    %214 = vector.broadcast %213 : vector<1x64xf32> to vector<16x64xf32>
    %215 = arith.addf %211, %214 : vector<16x64xf32>
    %cst_130 = arith.constant 0.000000e+00 : f32
    %216 = vector.broadcast %cst_130 : f32 to vector<16x64xf32>
    %217 = arith.maximumf %215, %216 : vector<16x64xf32>
    %218 = arith.truncf %217 : vector<16x64xf32> to vector<16x64xbf16>
    %c1_131 = arith.constant 1 : index
    %c0_132 = arith.constant 0 : index
    %c0_133 = arith.constant 0 : index
    %219 = vector.load %arg12[%c1_131, %c0_132, %c0_133] : memref<2x64x32xbf16, #tpu.memory_space<vmem>>, vector<1x64x32xbf16>
    %220 = vector.shape_cast %219 : vector<1x64x32xbf16> to vector<64x32xbf16>
    %cst_134 = arith.constant dense<0.000000e+00> : vector<16x32xf32>
    %221 = tpu.matmul %218, %220, %cst_134 {dimension_numbers = #tpu.dot_dimension_numbers<[1], [0], [0], [1], [0, 0, 1, 1], [], []>} : vector<16x64xbf16>, vector<64x32xbf16>, vector<16x32xf32> -> vector<16x32xf32>
    %c1_135 = arith.constant 1 : index
    %c0_136 = arith.constant 0 : index
    %c0_137 = arith.constant 0 : index
    %222 = vector.load %arg13[%c1_135, %c0_136, %c0_137] : memref<2x1x32xf32, #tpu.memory_space<vmem>>, vector<1x1x32xf32>
    %223 = vector.shape_cast %222 : vector<1x1x32xf32> to vector<1x32xf32>
    %224 = vector.broadcast %223 : vector<1x32xf32> to vector<16x32xf32>
    %225 = arith.addf %221, %224 : vector<16x32xf32>
    %226 = arith.addf %181, %225 : vector<16x32xf32>
    %227 = vector.shape_cast %226 : vector<16x32xf32> to vector<2x8x32xf32>
    %cst_138 = arith.constant dense<0.000000e+00> : vector<2x32xf32>
    %228 = vector.multi_reduction <add>, %227, %cst_138 [1] : vector<2x8x32xf32> to vector<2x32xf32>
    %cst_139 = arith.constant 8.000000e+00 : f32
    %229 = vector.broadcast %cst_139 : f32 to vector<2x32xf32>
    %230 = arith.divf %228, %229 : vector<2x32xf32>
    %231 = arith.truncf %230 : vector<2x32xf32> to vector<2x32xbf16>
    %c0_140 = arith.constant 0 : index
    %c0_141 = arith.constant 0 : index
    %232 = vector.load %arg14[%c0_140, %c0_141] : memref<32x32xbf16, #tpu.memory_space<vmem>>, vector<32x32xbf16>
    %cst_142 = arith.constant dense<0.000000e+00> : vector<2x32xf32>
    %233 = tpu.matmul %231, %232, %cst_142 {dimension_numbers = #tpu.dot_dimension_numbers<[1], [0], [0], [1], [0, 0, 1, 1], [], []>} : vector<2x32xbf16>, vector<32x32xbf16>, vector<2x32xf32> -> vector<2x32xf32>
    %c0_143 = arith.constant 0 : index
    %c0_144 = arith.constant 0 : index
    %234 = vector.load %arg15[%c0_143, %c0_144] : memref<1x32xf32, #tpu.memory_space<vmem>>, vector<1x32xf32>
    %235 = vector.broadcast %234 : vector<1x32xf32> to vector<2x32xf32>
    %236 = arith.addf %233, %235 : vector<2x32xf32>
    %cst_145 = arith.constant 0.000000e+00 : f32
    %237 = vector.broadcast %cst_145 : f32 to vector<2x32xf32>
    %238 = arith.maximumf %236, %237 : vector<2x32xf32>
    %239 = arith.truncf %238 : vector<2x32xf32> to vector<2x32xbf16>
    %c0_146 = arith.constant 0 : index
    %c0_147 = arith.constant 0 : index
    %240 = vector.load %arg16[%c0_146, %c0_147] : memref<32x4xbf16, #tpu.memory_space<vmem>>, vector<32x4xbf16>
    %cst_148 = arith.constant dense<0.000000e+00> : vector<2x4xf32>
    %241 = tpu.matmul %239, %240, %cst_148 {dimension_numbers = #tpu.dot_dimension_numbers<[1], [0], [0], [1], [0, 0, 1, 1], [], []>} : vector<2x32xbf16>, vector<32x4xbf16>, vector<2x4xf32> -> vector<2x4xf32>
    %c0_149 = arith.constant 0 : index
    %c0_150 = arith.constant 0 : index
    %242 = vector.load %arg17[%c0_149, %c0_150] : memref<1x4xf32, #tpu.memory_space<vmem>>, vector<1x4xf32>
    %243 = vector.broadcast %242 : vector<1x4xf32> to vector<2x4xf32>
    %244 = arith.addf %241, %243 : vector<2x4xf32>
    %c0_151 = arith.constant 0 : index
    %c0_152 = arith.constant 0 : index
    %245 = vector.load %arg18[%c0_151, %c0_152] : memref<2x4xf32, #tpu.memory_space<vmem>>, vector<2x4xf32>
    tpu.vector_store %arg18[%c0_151, %c0_152], %244 {strides = array<i32>} : memref<2x4xf32, #tpu.memory_space<vmem>>, vector<2x4xf32>,
    return
  }
}

</mosaic_0001>

<bundles_post_ra>
// kernel: classifier_forward.1
= control target key start
LH: loop header
LB: loop body
LE: loop exit
PB: predicated region body
PF: predicated region fallthrough
CT: control target
= control target key end

     0   :  { %s7171_s0 = inlined_call_operand.vmem [shape: f32[16,32], index: 0, kind: input, shape index: {}]   ;;  %s7172_s1 = inlined_call_operand.vmem [shape: f32[2,1,32], index: 1, kind: input, shape index: {}]   ;;  %s7173_s2 = inlined_call_operand.vmem [shape: f32[2,1,32], index: 2, kind: input, shape index: {}]   ;;  %s7174_s3 = inlined_call_operand.vmem [shape: bf16[2,4,32,8], index: 3, kind: input, shape index: {}]   ;;  %s7175_s4 = inlined_call_operand.vmem [shape: bf16[2,4,32,8], index: 4, kind: input, shape index: {}]   ;;  %s7176_s5 = inlined_call_operand.vmem [shape: bf16[2,4,32,8], index: 5, kind: input, shape index: {}]   ;;  %s7177_s6 = inlined_call_operand.vmem [shape: bf16[2,4,8,32], index: 6, kind: input, shape index: {}]   ;;  %s7178_s7 = inlined_call_operand.vmem [shape: f32[2,1,32], index: 7, kind: input, shape index: {}]   ;;  %s7179_s8 = inlined_call_operand.vmem [shape: f32[2,1,32], index: 8, kind: input, shape index: {}]   ;;  %s7180_s9 = inlined_call_operand.vmem [shape: f32[2,1,32], index: 9, kind: input, shape index: {}]   ;;  %s7181_s10 = inlined_call_operand.vmem [shape: bf16[2,32,64], index: 10, kind: input, shape index: {}]   ;;  %s7182_s11 = inlined_call_operand.vmem [shape: f32[2,1,64], index: 11, kind: input, shape index: {}]   ;;  %s7183_s12 = inlined_call_operand.vmem [shape: bf16[2,64,32], index: 12, kind: input, shape index: {}]   ;;  %s7184_s13 = inlined_call_operand.vmem [shape: f32[2,1,32], index: 13, kind: input, shape index: {}]   ;;  %s7185_s14 = inlined_call_operand.vmem [shape: bf16[32,32], index: 14, kind: input, shape index: {}]   ;;  %s7186_s15 = inlined_call_operand.vmem [shape: f32[1,32], index: 15, kind: input, shape index: {}]   ;;  %s7187_s16 = inlined_call_operand.vmem [shape: bf16[32,4], index: 16, kind: input, shape index: {}]   ;;  %s7188_s17 = inlined_call_operand.vmem [shape: f32[1,4], index: 17, kind: input, shape index: {}]   ;;  %s7189_s18 = inlined_call_operand.hbm [shape: f32[2,4], index: 18, kind: output, shape index: {0}]   ;;  %s7190_s19 = inlined_call_operand.vmem [shape: f32[8,2,8,8], index: 19, kind: output, shape index: {1}]  }
   0x1   :  { %7195 = sst [smem:[#allocation5_spill]] %s7171_s0 }
   0x2   :  { %7196 = sst [smem:[#allocation6_spill]] %s7172_s1 }
   0x3   :  { %7197 = sst [smem:[#allocation7_spill]] %s7173_s2 }
   0x4   :  { %7198 = sst [smem:[#allocation8_spill]] %s7174_s3 }
   0x5   :  { %s7199_s20 = sld [smem:[#allocation5_spill]]  ;;  %vm67_vm0 = vcmask 261120  }
   0xb   :  { %v63_v0 = vld [vmem:[%s7199_s20] sm:$0xff]  ;;  %v64_v1 = vld [vmem:[%s7199_s20 + $0x8] sm:$0xff] }
   0xc   :  { %v68_v2 = vsel %vm67_vm0, %v63_v0, 0.0  ;;  %v71_v3 = vsel %vm67_vm0, %v64_v1, 0.0 }
   0xd   :  { %69 = vadd.xlane.f32.xlu0 %v68_v2 }
  0x11   :  { %72 = vadd.xlane.f32.xlu0 %v71_v3 }
  0x12   :  { %25 = vsyncpa [#allocation3], 0  ;;  %s7200_s23 = sld [smem:[#allocation8_spill]]  ;;  %v6210_v16 = vmov 0.0   ;;  %vm6211_vm1 = vmmov 0   ;;  %s7201_s30 = sld [smem:[#allocation6_spill]] }
  0x13   :  { %5581 = vmatprep.subr.bf16.mxu0 %v6210_v16  ;;  %5589 = vmatprep.subr.bf16.mxu1 %v6210_v16  ;;  %s7202_s22 = sld [smem:[#allocation7_spill]]  ;;  %v6048_v40 = vld [vmem:[%s7175_s4] sm:$0xff]   ;;  %v6049_v41 = vld [vmem:[%s7175_s4 + $0x10] sm:$0xff]   ;;  %v6050_v42 = vld [vmem:[%s7175_s4 + $0x8] sm:$0xff]   ;;  %vm799_vm2 = vcmask 64512   ;;  %vm2107_vm3 = vcmask 1043456  }
  0x14   :  { %5585 = vmatprep.mubr.msk.bf16.mxu0 %vm6211_vm1, %v6210_v16  ;;  %5593 = vmatprep.mubr.msk.bf16.mxu1 %vm6211_vm1, %v6210_v16  ;;  %v6051_v43 = vld [vmem:[%s7175_s4 + $0x18] sm:$0xff]   ;;  %v6052_v44 = vld [vmem:[%s7175_s4 + $0x20] sm:$0xff]   ;;  %v6053_v45 = vld [vmem:[%s7175_s4 + $0x30] sm:$0xff]   ;;  %vm2472_vm4 = vcmask 523264   ;;  %vm5016_vm5 = vcmask 1041409   ;;  %vm5142_vm6 = vcmask 25600  }
  0x15   :  { %v6054_v46 = vld [vmem:[%s7175_s4 + $0x28] sm:$0xff]   ;;  %v6055_v47 = vld [vmem:[%s7175_s4 + $0x38] sm:$0xff]   ;;  %v6056_v48 = vld [vmem:[%s7176_s5] sm:$0xff]  }
  0x16   :  { %v6057_v49 = vld [vmem:[%s7176_s5 + $0x10] sm:$0xff]   ;;  %v6058_v50 = vld [vmem:[%s7176_s5 + $0x8] sm:$0xff]   ;;  %v6059_v51 = vld [vmem:[%s7176_s5 + $0x18] sm:$0xff]  }
  0x17   :  { %v6060_v52 = vld [vmem:[%s7176_s5 + $0x20] sm:$0xff]   ;;  %v6061_v53 = vld [vmem:[%s7176_s5 + $0x30] sm:$0xff]   ;;  %v6062_v54 = vld [vmem:[%s7176_s5 + $0x28] sm:$0xff]  }
  0x18   :  { %v6040_v14 = vld [vmem:[%s7200_s23] sm:$0xff]   ;;  %v6041_v15 = vld [vmem:[%s7200_s23 + $0x10] sm:$0xff]   ;;  %v6042_v17 = vld [vmem:[%s7200_s23 + $0x8] sm:$0xff]  }
  0x19   :  { %5582 = vmatpush3.bf16.msra.mxu0 %v6040_v14  ;;  %5590 = vmatpush3.bf16.msra.mxu1 %v6041_v15  ;;  %v6043_v18 = vld [vmem:[%s7200_s23 + $0x18] sm:$0xff]   ;;  %v5162_v27 = vld [vmem:[%s7201_s30] ss:$0 sm:$0xff]  ;;  %v6045_v36 = vld [vmem:[%s7200_s23 + $0x30] sm:$0xff]  }
  0x1a   :  { %5583 = vmatprep.subr.bf16.mxu0 %v6210_v16  ;;  %5591 = vmatprep.subr.bf16.mxu1 %v6210_v16  ;;  %v5163_v31 = vld [vmem:[%s7202_s22] ss:$0 sm:$0xff]  ;;  %v6046_v38 = vld [vmem:[%s7200_s23 + $0x28] sm:$0xff]   ;;  %v6047_v39 = vld [vmem:[%s7200_s23 + $0x38] sm:$0xff]  }
  0x1b   :  { %v6044_v35 = vld [vmem:[%s7200_s23 + $0x20] sm:$0xff]   ;;  %v6063_v55 = vld [vmem:[%s7176_s5 + $0x38] sm:$0xff]  }
  0x1d   :  { %5584 = vmatpush3.bf16.msra.mxu0 %v6042_v17  ;;  %5592 = vmatpush3.bf16.msra.mxu1 %v6043_v18 }
  0x1e   :  { %5597 = vmatprep.subr.bf16.mxu0 %v6210_v16  ;;  %5605 = vmatprep.subr.bf16.mxu1 %v6210_v16 }
  0x9a   :  { %v70_v4 = vpop.xlane.xlu0 %69 }
  0x9b   :  { %v75_v5 = vmul.f32 0.03125, %v70_v4 }
  0x9d   :  { %v77_v6 = vsub.f32 %v63_v0, %v75_v5 }
  0x9e   :  { %v73_v7 = vpop.xlane.xlu0 %72 }
  0x9f   :  { %v76_v8 = vmul.f32 0.03125, %v73_v7  ;;  %v79_v9 = vmul.f32 %v77_v6, %v77_v6 }
  0xa1   :  { %v78_v10 = vsub.f32 %v64_v1, %v76_v8  ;;  %v81_v11 = vsel %vm67_vm0, %v79_v9, 0.0 }
  0xa2   :  { %82 = vadd.xlane.f32.xlu1 %v81_v11 }
  0xa3   :  { %v80_v12 = vmul.f32 %v78_v10, %v78_v10 }
  0xa5   :  { %v84_v13 = vsel %vm67_vm0, %v80_v12, 0.0 }
  0xa6   :  { %85 = vadd.xlane.f32.xlu1 %v84_v13 }
 0x12f   :  { %v83_v19 = vpop.xlane.xlu1 %82 }
 0x130   :  { %v87_v20 = vmul.f32 0.03125, %v83_v19 }
 0x132   :  { %v89_v21 = vadd.f32 1e-05, %v87_v20 }
 0x133   :  { %v86_v22 = vpop.xlane.xlu1 %85 }
 0x134   :  { %6104 = vrsqrt.f32 %v89_v21  ;;  %v88_v23 = vmul.f32 0.03125, %v86_v22 }
 0x136   :  { %v90_v24 = vadd.f32 1e-05, %v88_v23 }
 0x138   :  { %6106 = vrsqrt.f32 %v90_v24 }
 0x13e   :  { %v6105_v25 = vpop.eup %6104 }
 0x13f   :  { %v93_v26 = vmul.f32 %v6105_v25, %v77_v6 }
 0x141   :  { %v101_v29 = vmul.f32 %v5162_v27, %v93_v26 }
 0x142   :  { %v6107_v28 = vpop.eup %6106 }
 0x143   :  { %v94_v30 = vmul.f32 %v6107_v28, %v78_v10  ;;  %v109_v33 = vadd.f32 %v5163_v31, %v101_v29 }
 0x145   :  { %v102_v32 = vmul.f32 %v5162_v27, %v94_v30 }
 0x147   :  { %v110_v34 = vadd.f32 %v5163_v31, %v102_v32 }
 0x149   :  { %v6357_v37 = vpack.c.bf16 %v110_v34, %v109_v33 }
 0x14b   :  { %5586 = vmatmul.mubr.msk.bf16.vlgmr.msra.gmra.mrb[0].mxu0 %vm67_vm0, %v6357_v37  ;;  %5594 = vmatmul.mubr.msk.bf16.vlgmr.msra.gmra.mrb[0].mxu1 %vm67_vm0, %v6357_v37 }
 0x14c   :  { %5598 = vmatpush3.bf16.msra.mxu0 %v6044_v35  ;;  %5606 = vmatpush3.bf16.msra.mxu1 %v6045_v36 }
 0x14d   :  { %5599 = vmatprep.subr.bf16.mxu0 %v6210_v16  ;;  %5607 = vmatprep.subr.bf16.mxu1 %v6210_v16 }
 0x14e   :  { %5601 = vmatprep.mubr.msk.bf16.mxu0 %vm6211_vm1, %v6210_v16  ;;  %5609 = vmatprep.mubr.msk.bf16.mxu1 %vm6211_vm1, %v6210_v16 }
 0x150   :  { %5600 = vmatpush3.bf16.msra.mxu0 %v6046_v38  ;;  %5608 = vmatpush3.bf16.msra.mxu1 %v6047_v39 }
 0x151   :  { %5613 = vmatprep.subr.bf16.mxu0 %v6210_v16  ;;  %5621 = vmatprep.subr.bf16.mxu1 %v6210_v16 }
 0x153   :  { %5602 = vmatmul.mubr.msk.bf16.vlgmr.msra.gmra.mrb[4].mxu0 %vm67_vm0, %v6357_v37  ;;  %5610 = vmatmul.mubr.msk.bf16.vlgmr.msra.gmra.mrb[4].mxu1 %vm67_vm0, %v6357_v37 }
 0x154   :  { %5614 = vmatpush3.bf16.msra.mxu0 %v6048_v40  ;;  %5622 = vmatpush3.bf16.msra.mxu1 %v6049_v41 }
 0x155   :  { %5615 = vmatprep.subr.bf16.mxu0 %v6210_v16  ;;  %5623 = vmatprep.subr.bf16.mxu1 %v6210_v16 }
 0x156   :  { %5617 = vmatprep.mubr.msk.bf16.mxu0 %vm6211_vm1, %v6210_v16  ;;  %5625 = vmatprep.mubr.msk.bf16.mxu1 %vm6211_vm1, %v6210_v16 }
 0x158   :  { %5616 = vmatpush3.bf16.msra.mxu0 %v6050_v42  ;;  %5624 = vmatpush3.bf16.msra.mxu1 %v6051_v43 }
 0x159   :  { %5629 = vmatprep.subr.bf16.mxu0 %v6210_v16  ;;  %5637 = vmatprep.subr.bf16.mxu1 %v6210_v16 }
 0x15b   :  { %5618 = vmatmul.mubr.msk.bf16.vlgmr.msra.gmra.mrb[8].mxu0 %vm67_vm0, %v6357_v37  ;;  %5626 = vmatmul.mubr.msk.bf16.vlgmr.msra.gmra.mrb[8].mxu1 %vm67_vm0, %v6357_v37 }
 0x15c   :  { %5630 = vmatpush3.bf16.msra.mxu0 %v6052_v44  ;;  %5638 = vmatpush3.bf16.msra.mxu1 %v6053_v45 }
 0x15d   :  { %5631 = vmatprep.subr.bf16.mxu0 %v6210_v16  ;;  %5639 = vmatprep.subr.bf16.mxu1 %v6210_v16 }
 0x15e   :  { %5633 = vmatprep.mubr.msk.bf16.mxu0 %vm6211_vm1, %v6210_v16  ;;  %5641 = vmatprep.mubr.msk.bf16.mxu1 %vm6211_vm1, %v6210_v16 }
 0x160   :  { %5632 = vmatpush3.bf16.msra.mxu0 %v6054_v46  ;;  %5640 = vmatpush3.bf16.msra.mxu1 %v6055_v47 }
 0x161   :  { %5645 = vmatprep.subr.bf16.mxu0 %v6210_v16  ;;  %5653 = vmatprep.subr.bf16.mxu1 %v6210_v16 }
 0x163   :  { %5634 = vmatmul.mubr.msk.bf16.vlgmr.msra.gmra.mrb[12].mxu0 %vm67_vm0, %v6357_v37  ;;  %5642 = vmatmul.mubr.msk.bf16.vlgmr.msra.gmra.mrb[12].mxu1 %vm67_vm0, %v6357_v37 }
 0x164   :  { %5646 = vmatpush3.bf16.msra.mxu0 %v6056_v48  ;;  %5654 = vmatpush3.bf16.msra.mxu1 %v6057_v49 }
 0x165   :  { %5647 = vmatprep.subr.bf16.mxu0 %v6210_v16  ;;  %5655 = vmatprep.subr.bf16.mxu1 %v6210_v16 }
 0x166   :  { %5649 = vmatprep.mubr.msk.bf16.mxu0 %vm6211_vm1, %v6210_v16  ;;  %5657 = vmatprep.mubr.msk.bf16.mxu1 %vm6211_vm1, %v6210_v16 }
 0x168   :  { %5648 = vmatpush3.bf16.msra.mxu0 %v6058_v50  ;;  %5656 = vmatpush3.bf16.msra.mxu1 %v6059_v51 }
 0x169   :  { %5661 = vmatprep.subr.bf16.mxu0 %v6210_v16  ;;  %5669 = vmatprep.subr.bf16.mxu1 %v6210_v16 }
 0x16b   :  { %5650 = vmatmul.mubr.msk.bf16.vlgmr.msra.gmra.mrb[16].mxu0 %vm67_vm0, %v6357_v37  ;;  %5658 = vmatmul.mubr.msk.bf16.vlgmr.msra.gmra.mrb[16].mxu1 %vm67_vm0, %v6357_v37 }
 0x16c   :  { %5662 = vmatpush3.bf16.msra.mxu0 %v6060_v52  ;;  %5670 = vmatpush3.bf16.msra.mxu1 %v6061_v53 }
 0x16d   :  { %5663 = vmatprep.subr.bf16.mxu0 %v6210_v16  ;;  %5671 = vmatprep.subr.bf16.mxu1 %v6210_v16 }
 0x16e   :  { %5665 = vmatprep.mubr.msk.bf16.mxu0 %vm6211_vm1, %v6210_v16  ;;  %5673 = vmatprep.mubr.msk.bf16.mxu1 %vm6211_vm1, %v6210_v16 }
 0x170   :  { %5664 = vmatpush3.bf16.msra.mxu0 %v6062_v54  ;;  %5672 = vmatpush3.bf16.msra.mxu1 %v6063_v55 }
 0x171   :  { %5677 = vmatprep.subr.mxu1 %v6210_v16  ;;  %5687 = vmatprep.subr.mxu0 %v6210_v16 }
 0x173   :  { %5666 = vmatmul.mubr.msk.bf16.vlgmr.msra.gmra.mrb[20].mxu0 %vm67_vm0, %v6357_v37  ;;  %5674 = vmatmul.mubr.msk.bf16.vlgmr.msra.gmra.mrb[20].mxu1 %vm67_vm0, %v6357_v37 }
 0x174   :  { %5679 = vmatprep.mubr.msk.f32.mxu1 %vm6211_vm1, %v6210_v16  ;;  %5689 = vmatprep.mubr.msk.f32.mxu0 %vm6211_vm1, %v6210_v16 }
 0x21e   :  { %v177_v56 = vpop.f32.mrb[0].mxu0  ;;  %v230_v57 = vpop.f32.mrb[0].mxu1 }
 0x21f   :  { %v5587_v58 = vpop.f32.mrb[1].mxu0  ;;  %v5595_v59 = vpop.f32.mrb[1].mxu1 }
 0x220   :  { %v180_v60 = vpop.f32.mrb[2].mxu0  ;;  %v233_v61 = vpop.f32.mrb[2].mxu1 }
 0x221   :  { %v5588_v62 = vpop.f32.mrb[3].mxu0  ;;  %v5596_v63 = vpop.f32.mrb[3].mxu1 }
 0x226   :  { %v283_v0 = vpop.f32.mrb[4].mxu0  ;;  %v336_v1 = vpop.f32.mrb[4].mxu1 }
 0x227   :  { %v5603_v2 = vpop.f32.mrb[5].mxu0  ;;  %v5611_v3 = vpop.f32.mrb[5].mxu1 }
 0x228   :  { %v286_v4 = vpop.f32.mrb[6].mxu0  ;;  %v339_v5 = vpop.f32.mrb[6].mxu1 }
 0x229   :  { %v5604_v6 = vpop.f32.mrb[7].mxu0  ;;  %v5612_v7 = vpop.f32.mrb[7].mxu1 }
 0x22e   :  { %v405_v8 = vpop.f32.mrb[8].mxu0  ;;  %v458_v9 = vpop.f32.mrb[8].mxu1 }
 0x22f   :  { %v5619_v10 = vpop.f32.mrb[9].mxu0  ;;  %v5627_v11 = vpop.f32.mrb[9].mxu1  ;;  %5678 = vmatpush3.xpose.msk.msra.mxu1 %vm799_vm2, %v405_v8  ;;  %5688 = vmatpush3.xpose.msk.msra.mxu0 %vm799_vm2, %v458_v9 }
 0x230   :  { %v408_v12 = vpop.f32.mrb[10].mxu0  ;;  %v461_v13 = vpop.f32.mrb[10].mxu1  ;;  %5682 = vmatprep.subr.mxu1 %v6210_v16  ;;  %5697 = vmatprep.subr.mxu0 %v6210_v16 }
 0x231   :  { %v5620_v14 = vpop.f32.mrb[11].mxu0  ;;  %v5628_v15 = vpop.f32.mrb[11].mxu1 }
 0x232   :  { %5680 = vmatmul.mubr.msk.f32.vlgmr.msra.gmra.mrb[24].mxu1 %vm799_vm2, %v177_v56  ;;  %5690 = vmatmul.mubr.msk.f32.vlgmr.msra.gmra.mrb[24].mxu0 %vm799_vm2, %v230_v57 }
 0x233   :  { %5683 = vmatpush3.xpose.msk.msra.mxu1 %vm799_vm2, %v408_v12  ;;  %5684 = vmatprep.mubr.msk.f32.mxu1 %vm6211_vm1, %v6210_v16 }
 0x234   :  { %5692 = vmatprep.subr.mxu1 %v6210_v16  ;;  %5699 = vmatprep.mubr.msk.f32.mxu0 %vm6211_vm1, %v6210_v16 }
 0x236   :  { %v511_v17 = vpop.f32.mrb[12].mxu0  ;;  %v564_v18 = vpop.f32.mrb[12].mxu1  ;;  %5685 = vmatmul.mubr.msk.f32.vlgmr.msra.gmra.mrb[26].mxu1 %vm799_vm2, %v180_v60 }
 0x237   :  { %v5635_v19 = vpop.f32.mrb[13].mxu0  ;;  %v5643_v20 = vpop.f32.mrb[13].mxu1  ;;  %5693 = vmatpush3.xpose.msk.msra.mxu1 %vm799_vm2, %v461_v13  ;;  %5698 = vmatpush3.xpose.msk.msra.mxu0 %vm799_vm2, %v511_v17 }
 0x238   :  { %v514_v21 = vpop.f32.mrb[14].mxu0  ;;  %v567_v22 = vpop.f32.mrb[14].mxu1  ;;  %5694 = vmatprep.mubr.msk.f32.mxu1 %vm6211_vm1, %v6210_v16  ;;  %5702 = vmatprep.subr.mxu1 %v6210_v16 }
 0x239   :  { %v5636_v23 = vpop.f32.mrb[15].mxu0  ;;  %v5644_v24 = vpop.f32.mrb[15].mxu1  ;;  %5707 = vmatprep.subr.mxu0 %v6210_v16 }
 0x23a   :  { %5695 = vmatmul.mubr.msk.f32.vlgmr.msra.gmra.mrb[28].mxu1 %vm799_vm2, %v233_v61  ;;  %5700 = vmatmul.mubr.msk.f32.vlgmr.msra.gmra.mrb[26].mxu0 %vm799_vm2, %v283_v0 }
 0x23b   :  { %5703 = vmatpush3.xpose.msk.msra.mxu1 %vm799_vm2, %v514_v21  ;;  %5708 = vmatpush3.xpose.msk.msra.mxu0 %vm799_vm2, %v564_v18 }
 0x23c   :  { %5704 = vmatprep.mubr.msk.f32.mxu1 %vm6211_vm1, %v6210_v16  ;;  %5709 = vmatprep.mubr.msk.f32.mxu0 %vm6211_vm1, %v6210_v16 }
 0x23d   :  { %5712 = vmatprep.subr.mxu1 %v6210_v16  ;;  %5717 = vmatprep.subr.mxu0 %v6210_v16 }
 0x23e   :  { %v633_v25 = vpop.f32.mrb[16].mxu0  ;;  %v6510_v26 = vpop.f32.mrb[16].mxu1  ;;  %5705 = vmatmul.mubr.msk.f32.vlgmr.msra.gmra.mrb[30].mxu1 %vm799_vm2, %v286_v4  ;;  %5710 = vmatmul.mubr.msk.f32.vlgmr.msra.gmra.mrb[28].mxu0 %vm799_vm2, %v336_v1 }
 0x23f   :  { %v5651_v27 = vpop.f32.mrb[17].mxu0  ;;  %v5659_v28 = vpop.f32.mrb[17].mxu1  ;;  %5713 = vmatpush3.xpose.msk.msra.mxu1 %vm799_vm2, %v567_v22  ;;  %5718 = vmatpush3.msra.mxu0 %v633_v25 }
 0x240   :  { %v636_v29 = vpop.f32.mrb[18].mxu0  ;;  %v6515_v30 = vpop.f32.mrb[18].mxu1  ;;  %5714 = vmatprep.mubr.msk.f32.mxu1 %vm6211_vm1, %v6210_v16  ;;  %5722 = vmatprep.subr.mxu1 %v6210_v16 }
 0x241   :  { %v5652_v31 = vpop.f32.mrb[19].mxu0  ;;  %v5660_v32 = vpop.f32.mrb[19].mxu1  ;;  %5719 = vmatprep.mubr.msk.f32.mxu0 %vm6211_vm1, %v6210_v16  ;;  %5727 = vmatprep.subr.mxu0 %v6210_v16 }
 0x242   :  { %5715 = vmatmul.mubr.msk.f32.vlgmr.msra.gmra.mrb[32].mxu1 %vm799_vm2, %v339_v5 }
 0x243   :  { %5723 = vmatpush3.msra.mxu1 %v636_v29  ;;  %5724 = vmatprep.mubr.msk.f32.mxu1 %vm6211_vm1, %v6210_v16 }
 0x244   :  { %5732 = vmatprep.subr.mxu1 %v6210_v16 }
 0x246   :  { %v6527_v33 = vpop.f32.mrb[20].mxu0  ;;  %v6529_v34 = vpop.f32.mrb[20].mxu1 }
 0x247   :  { %v5667_v35 = vpop.f32.mrb[21].mxu0  ;;  %v5675_v36 = vpop.f32.mrb[21].mxu1 }
 0x248   :  { %v6531_v37 = vpop.f32.mrb[22].mxu0  ;;  %v6533_v38 = vpop.f32.mrb[22].mxu1 }
 0x249   :  { %v5668_v39 = vpop.f32.mrb[23].mxu0  ;;  %v5676_v40 = vpop.f32.mrb[23].mxu1 }
 0x305   :  { %v872_v41 = vpop.f32.mrb[24].mxu1  ;;  %v1024_v42 = vpop.f32.mrb[24].mxu0 }
 0x306   :  { %v1408_v43 = vmul.f32 0.35355338, %v872_v41  ;;  %v5681_v44 = vpop.f32.mrb[25].mxu1  ;;  %v5691_v45 = vpop.f32.mrb[25].mxu0  ;;  %v1410_v46 = vmul.f32 0.35355338, %v1024_v42 }
 0x308   :  { %v1416_v47 = vsel %vm799_vm2, %v1408_v43, -inf  ;;  %v1422_v52 = vsel %vm799_vm2, %v1410_v46, -inf }
 0x309   :  { %1417 = vmax.xlane.f32.xlu0 %v1416_v47  ;;  %v948_v48 = vpop.f32.mrb[26].mxu1 }
 0x30a   :  { %v1409_v49 = vmul.f32 0.35355338, %v948_v48  ;;  %v5686_v50 = vpop.f32.mrb[27].mxu1 }
 0x30c   :  { %v1419_v51 = vsel %vm799_vm2, %v1409_v49, -inf }
 0x30d   :  { %1420 = vmax.xlane.f32.xlu1 %v1419_v51  ;;  %v1100_v53 = vpop.f32.mrb[28].mxu1  ;;  %1423 = vmax.xlane.f32.xlu0 %v1422_v52  ;;  %v1176_v54 = vpop.f32.mrb[26].mxu0 }
 0x30e   :  { %v1411_v55 = vmul.f32 0.35355338, %v1100_v53  ;;  %v1412_v56 = vmul.f32 0.35355338, %v1176_v54  ;;  %v5696_v57 = vpop.f32.mrb[29].mxu1  ;;  %v5701_v58 = vpop.f32.mrb[27].mxu0 }
 0x310   :  { %v1425_v59 = vsel %vm799_vm2, %v1411_v55, -inf  ;;  %v1428_v60 = vsel %vm799_vm2, %v1412_v56, -inf }
 0x311   :  { %1426 = vmax.xlane.f32.xlu1 %v1425_v59  ;;  %v1252_v61 = vpop.f32.mrb[30].mxu1  ;;  %1429 = vmax.xlane.f32.xlu0 %v1428_v60  ;;  %v1328_v62 = vpop.f32.mrb[28].mxu0 }
 0x312   :  { %v1413_v63 = vmul.f32 0.35355338, %v1252_v61  ;;  %v1414_v0 = vmul.f32 0.35355338, %v1328_v62  ;;  %v5706_v1 = vpop.f32.mrb[31].mxu1  ;;  %v5711_v2 = vpop.f32.mrb[29].mxu0 }
 0x314   :  { %v1431_v3 = vsel %vm799_vm2, %v1413_v63, -inf  ;;  %v1434_v4 = vsel %vm799_vm2, %v1414_v0, -inf }
 0x315   :  { %1432 = vmax.xlane.f32.xlu1 %v1431_v3  ;;  %v1404_v5 = vpop.f32.mrb[32].mxu1  ;;  %1435 = vmax.xlane.f32.xlu0 %v1434_v4 }
 0x316   :  { %v1415_v6 = vmul.f32 0.35355338, %v1404_v5  ;;  %v5716_v7 = vpop.f32.mrb[33].mxu1 }
 0x318   :  { %v1437_v8 = vsel %vm799_vm2, %v1415_v6, -inf }
 0x319   :  { %1438 = vmax.xlane.f32.xlu1 %v1437_v8 }
 0x396   :  { %v1418_v9 = vpop.xlane.xlu0 %1417 }
 0x397   :  { %v1440_v10 = vsub.f32 %v1408_v43, %v1418_v9 }
 0x399   :  { %v1448_v11 = vmul.f32 1.442695, %v1440_v10 }
 0x39a   :  { %v1421_v12 = vpop.xlane.xlu1 %1420  ;;  %v1424_v13 = vpop.xlane.xlu0 %1423 }
 0x39b   :  { %6108 = vpow2.f32 %v1448_v11  ;;  %v1441_v14 = vsub.f32 %v1409_v49, %v1421_v12  ;;  %v1442_v15 = vsub.f32 %v1410_v46, %v1424_v13  ;;  %v2101_v12 = vld [vmem:[%s7177_s6 + $0x4] sm:$0xf] }
 0x39c   :  { %v2156_v13 = vsel %vm2107_vm3, %v2101_v12, 0 }
 0x39d   :  { %v1450_v17 = vmul.f32 1.442695, %v1441_v14  ;;  %v1452_v18 = vmul.f32 1.442695, %v1442_v15 }
 0x39e   :  { %v1427_v19 = vpop.xlane.xlu1 %1426  ;;  %v1430_v20 = vpop.xlane.xlu0 %1429 }
 0x39f   :  { %6110 = vpow2.f32 %v1450_v17  ;;  %v1443_v21 = vsub.f32 %v1411_v55, %v1427_v19  ;;  %v1444_v22 = vsub.f32 %v1412_v56, %v1430_v20  ;;  %v2102_v17 = vld [vmem:[%s7177_s6 + $0x8] sm:$0xf] }
 0x3a0   :  { %6112 = vpow2.f32 %v1452_v18 }
 0x3a1   :  { %v1454_v23 = vmul.f32 1.442695, %v1443_v21  ;;  %v1456_v24 = vmul.f32 1.442695, %v1444_v22  ;;  %v2203_v22 = vsel %vm2107_vm3, %v2102_v17, 0 }
 0x3a2   :  { %v1433_v25 = vpop.xlane.xlu1 %1432  ;;  %v1436_v27 = vpop.xlane.xlu0 %1435 }
 0x3a3   :  { %6114 = vpow2.f32 %v1454_v23  ;;  %v1445_v28 = vsub.f32 %v1413_v63, %v1433_v25  ;;  %v1446_v29 = vsub.f32 %v1414_v0, %v1436_v27 }
 0x3a4   :  { %6116 = vpow2.f32 %v1456_v24  ;;  %v2103_v24 = vld [vmem:[%s7177_s6 + $0xc] sm:$0xf] }
 0x3a5   :  { %v6109_v31 = vpop.eup %6108  ;;  %v1458_v32 = vmul.f32 1.442695, %v1445_v28  ;;  %v1460_v35 = vmul.f32 1.442695, %v1446_v29 }
 0x3a6   :  { %v1439_v36 = vpop.xlane.xlu1 %1438  ;;  %v1464_v39 = vsel %vm799_vm2, %v6109_v31, 0.0 }
 0x3a7   :  { %6118 = vpow2.f32 %v1458_v32  ;;  %v1447_v40 = vsub.f32 %v1415_v6, %v1439_v36  ;;  %1465 = vadd.xlane.f32.xlu0 %v1464_v39 }
 0x3a8   :  { %6120 = vpow2.f32 %v1460_v35 }
 0x3a9   :  { %v6111_v41 = vpop.eup %6110  ;;  %v1462_v42 = vmul.f32 1.442695, %v1447_v40 }
 0x3aa   :  { %v6113_v43 = vpop.eup %6112  ;;  %v1467_v44 = vsel %vm799_vm2, %v6111_v41, 0.0 }
 0x3ab   :  { %6122 = vpow2.f32 %v1462_v42  ;;  %1468 = vadd.xlane.f32.xlu1 %v1467_v44  ;;  %v1470_v45 = vsel %vm799_vm2, %v6113_v43, 0.0 }
 0x3ac   :  { %1471 = vadd.xlane.f32.xlu0 %v1470_v45 }
 0x3ad   :  { %v6115_v46 = vpop.eup %6114 }
 0x3ae   :  { %v6117_v47 = vpop.eup %6116  ;;  %v1473_v48 = vsel %vm799_vm2, %v6115_v46, 0.0 }
 0x3af   :  { %1474 = vadd.xlane.f32.xlu1 %v1473_v48  ;;  %v1476_v49 = vsel %vm799_vm2, %v6117_v47, 0.0 }
 0x3b0   :  { %1477 = vadd.xlane.f32.xlu0 %v1476_v49 }
 0x3b1   :  { %v6119_v50 = vpop.eup %6118 }
 0x3b2   :  { %v6121_v51 = vpop.eup %6120  ;;  %v1479_v52 = vsel %vm799_vm2, %v6119_v50, 0.0 }
 0x3b3   :  { %1480 = vadd.xlane.f32.xlu1 %v1479_v52  ;;  %v1482_v53 = vsel %vm799_vm2, %v6121_v51, 0.0 }
 0x3b4   :  { %1483 = vadd.xlane.f32.xlu0 %v1482_v53 }
 0x3b5   :  { %v6550_v54 = vpop.eup %6122 }
 0x3b6   :  { %v1485_v55 = vsel %vm799_vm2, %v6550_v54, 0.0 }
 0x3b7   :  { %1486 = vadd.xlane.f32.xlu1 %v1485_v55 }
 0x434   :  { %v1466_v56 = vpop.xlane.xlu0 %1465 }
 0x435   :  { %6124 = vrcp.f32 %v1466_v56 }
 0x438   :  { %v1469_v57 = vpop.xlane.xlu1 %1468 }
 0x439   :  { %6126 = vrcp.f32 %v1469_v57  ;;  %v1472_v58 = vpop.xlane.xlu0 %1471 }
 0x43a   :  { %6128 = vrcp.f32 %v1472_v58 }
 0x43c   :  { %v1475_v59 = vpop.xlane.xlu1 %1474 }
 0x43d   :  { %6130 = vrcp.f32 %v1475_v59  ;;  %v1478_v60 = vpop.xlane.xlu0 %1477 }
 0x43e   :  { %6132 = vrcp.f32 %v1478_v60 }
 0x43f   :  { %v6125_v61 = vpop.eup %6124 }
 0x440   :  { %v1496_v62 = vmul.f32 %v6125_v61, %v6109_v31  ;;  %v1481_v63 = vpop.xlane.xlu1 %1480  ;;  %v2250_v31 = vsel %vm2107_vm3, %v2103_v24, 0 }
 0x441   :  { %6134 = vrcp.f32 %v1481_v63  ;;  %v1484_v0 = vpop.xlane.xlu0 %1483 }
 0x442   :  { %1504 = vst.msk [vmem:[%s7190_s19] sm:$0xff] %vm799_vm2, %v1496_v62  ;;  %6136 = vrcp.f32 %v1484_v0  ;;  %5720 = vmatmul.mubr.msk.f32.vlgmr.msra.gmra.mrb[30].mxu0 %vm799_vm2, %v1496_v62 }
 0x443   :  { %v6127_v1 = vpop.eup %6126  ;;  %5728 = vmatpush3.msra.mxu0 %v6510_v26  ;;  %5729 = vmatprep.mubr.msk.f32.mxu0 %vm6211_vm1, %v6210_v16 }
 0x444   :  { %v6129_v2 = vpop.eup %6128  ;;  %v1497_v3 = vmul.f32 %v6127_v1, %v6111_v41  ;;  %v1487_v4 = vpop.xlane.xlu1 %1486  ;;  %5737 = vmatprep.subr.mxu0 %v6210_v16 }
 0x445   :  { %v1498_v5 = vmul.f32 %v6129_v2, %v6113_v43  ;;  %6138 = vrcp.f32 %v1487_v4 }
 0x446   :  { %1505 = vst.msk [vmem:[%s7190_s19 + $0x8] sm:$0xff] %vm799_vm2, %v1497_v3  ;;  %5725 = vmatmul.mubr.msk.f32.vlgmr.msra.gmra.mrb[34].mxu1 %vm799_vm2, %v1497_v3 }
 0x447   :  { %v6131_v6 = vpop.eup %6130  ;;  %1506 = vst.msk [vmem:[%s7190_s19 + $0x10] sm:$0xff] %vm799_vm2, %v1498_v5  ;;  %5730 = vmatmul.mubr.msk.f32.vlgmr.msra.gmra.mrb[32].mxu0 %vm799_vm2, %v1498_v5  ;;  %5733 = vmatpush3.msra.mxu1 %v6515_v30  ;;  %v5228_v5 = vld [vmem:[%s7178_s7] ss:$0 sm:$0xff] }
 0x448   :  { %v6133_v26 = vpop.eup %6132  ;;  %v1499_v7 = vmul.f32 %v6131_v6, %v6115_v46  ;;  %5738 = vmatpush3.msra.mxu0 %v6527_v33  ;;  %5734 = vmatprep.mubr.msk.f32.mxu1 %vm6211_vm1, %v6210_v16 }
 0x449   :  { %v1500_v8 = vmul.f32 %v6133_v26, %v6117_v47  ;;  %5739 = vmatprep.mubr.msk.f32.mxu0 %vm6211_vm1, %v6210_v16  ;;  %5742 = vmatprep.subr.mxu1 %v6210_v16 }
 0x44a   :  { %1507 = vst.msk [vmem:[%s7190_s19 + $0x18] sm:$0xff] %vm799_vm2, %v1499_v7  ;;  %5747 = vmatprep.subr.mxu0 %v6210_v16  ;;  %5735 = vmatmul.mubr.msk.f32.vlgmr.msra.gmra.mrb[36].mxu1 %vm799_vm2, %v1499_v7 }
 0x44b   :  { %v6135_v30 = vpop.eup %6134  ;;  %1508 = vst.msk [vmem:[%s7190_s19 + $0x20] sm:$0xff] %vm799_vm2, %v1500_v8  ;;  %5740 = vmatmul.mubr.msk.f32.vlgmr.msra.gmra.mrb[34].mxu0 %vm799_vm2, %v1500_v8  ;;  %5743 = vmatpush3.msra.mxu1 %v6531_v37 }
 0x44c   :  { %v6137_v33 = vpop.eup %6136  ;;  %v1501_v9 = vmul.f32 %v6135_v30, %v6119_v50  ;;  %5748 = vmatpush3.msra.mxu0 %v6529_v34  ;;  %5744 = vmatprep.mubr.msk.f32.mxu1 %vm6211_vm1, %v6210_v16 }
 0x44d   :  { %v1502_v10 = vmul.f32 %v6137_v33, %v6121_v51  ;;  %5749 = vmatprep.mubr.msk.f32.mxu0 %vm6211_vm1, %v6210_v16  ;;  %5752 = vmatprep.subr.mxu1 %v6210_v16 }
 0x44e   :  { %1509 = vst.msk [vmem:[%s7190_s19 + $0x28] sm:$0xff] %vm799_vm2, %v1501_v9  ;;  %5745 = vmatmul.mubr.msk.f32.vlgmr.msra.gmra.mrb[38].mxu1 %vm799_vm2, %v1501_v9  ;;  %5757 = vmatprep.subr.bf16.mxu0 %v6210_v16 }
 0x44f   :  { %v6139_v37 = vpop.eup %6138  ;;  %1510 = vst.msk [vmem:[%s7190_s19 + $0x30] sm:$0xff] %vm799_vm2, %v1502_v10  ;;  %5750 = vmatmul.mubr.msk.f32.vlgmr.msra.gmra.mrb[36].mxu0 %vm799_vm2, %v1502_v10  ;;  %5753 = vmatpush3.msra.mxu1 %v6533_v38  ;;  %v2100_v38 = vld [vmem:[%s7177_s6] sm:$0xf] }
 0x450   :  { %v1503_v34 = vmul.f32 %v6139_v37, %v6550_v54  ;;  %5754 = vmatprep.mubr.msk.f32.mxu1 %vm6211_vm1, %v6210_v16  ;;  %5759 = vmatprep.mubr.msk.bf16.mxu0 %vm6211_vm1, %v6210_v16  ;;  %v2109_v11 = vsel %vm2107_vm3, %v2100_v38, 0  ;;  %v6184_v37 = vld [vmem:[%s7199_s20] sm:$0xff] }
 0x451   :  { %5763 = vmatprep.subr.bf16.mxu1 %v6210_v16  ;;  %5758 = vmatpush3.bf16.msra.mxu0 %v2109_v11  ;;  %v6185_v11 = vld [vmem:[%s7199_s20 + $0x8] sm:$0xff] }
 0x452   :  { %1511 = vst.msk [vmem:[%s7190_s19 + $0x38] sm:$0xff] %vm799_vm2, %v1503_v34  ;;  %5755 = vmatmul.mubr.msk.f32.vlgmr.msra.gmra.mrb[40].mxu1 %vm799_vm2, %v1503_v34  ;;  %5769 = vmatprep.subr.bf16.mxu0 %v6210_v16 }
 0x453   :  { %5765 = vmatprep.mubr.msk.bf16.mxu1 %vm6211_vm1, %v6210_v16  ;;  %5764 = vmatpush3.bf16.msra.mxu1 %v2156_v13 }
 0x454   :  { %5775 = vmatprep.subr.bf16.mxu1 %v6210_v16 }
 0x515   :  { %v1581_v14 = vpop.f32.mrb[30].mxu0 }
 0x516   :  { %v5721_v15 = vpop.f32.mrb[31].mxu0 }
 0x519   :  { %v1654_v18 = vpop.f32.mrb[34].mxu1 }
 0x51a   :  { %v2096_v19 = vpack.c.bf16 %v1654_v18, %v1581_v14  ;;  %v1727_v20 = vpop.f32.mrb[32].mxu0  ;;  %v5726_v21 = vpop.f32.mrb[35].mxu1 }
 0x51b   :  { %v5731_v23 = vpop.f32.mrb[33].mxu0 }
 0x51c   :  { %5760 = vmatmul.mubr.msk.bf16.vlgmr.msra.gmra.mrb[40].mxu0 %vm799_vm2, %v2096_v19 }
 0x51d   :  { %v1800_v25 = vpop.f32.mrb[36].mxu1  ;;  %5770 = vmatpush3.bf16.msra.mxu0 %v2203_v22  ;;  %5771 = vmatprep.mubr.msk.bf16.mxu0 %vm6211_vm1, %v6210_v16 }
 0x51e   :  { %v2097_v27 = vpack.c.bf16 %v1800_v25, %v1727_v20  ;;  %v1873_v28 = vpop.f32.mrb[34].mxu0  ;;  %v5736_v29 = vpop.f32.mrb[37].mxu1  ;;  %5781 = vmatprep.subr.bf16.mxu0 %v6210_v16  ;;  %v6064_v25 = vld [vmem:[%s7181_s10] sm:$0xff]  }
 0x51f   :  { %v5741_v32 = vpop.f32.mrb[35].mxu0  ;;  %v6067_v29 = vld [vmem:[%s7183_s12 + $0x8] sm:$0xff]  }
 0x520   :  { %5766 = vmatmul.mubr.msk.bf16.vlgmr.msra.gmra.mrb[44].mxu1 %vm799_vm2, %v2097_v27  ;;  %v6065_v27 = vld [vmem:[%s7181_s10 + $0x8] sm:$0xff]  }
 0x521   :  { %v1946_v35 = vpop.f32.mrb[38].mxu1  ;;  %5776 = vmatpush3.bf16.msra.mxu1 %v2250_v31  ;;  %5777 = vmatprep.mubr.msk.bf16.mxu1 %vm6211_vm1, %v6210_v16 }
 0x522   :  { %v2098_v36 = vpack.c.bf16 %v1946_v35, %v1873_v28  ;;  %v2019_v39 = vpop.f32.mrb[36].mxu0  ;;  %v5746_v40 = vpop.f32.mrb[39].mxu1  ;;  %5789 = vmatprep.subr.bf16.mxu1 %v6210_v16  ;;  %v6066_v28 = vld [vmem:[%s7183_s12] sm:$0xff]  }
 0x523   :  { %v5751_v41 = vpop.f32.mrb[37].mxu0 }
 0x524   :  { %5772 = vmatmul.mubr.msk.bf16.vlgmr.msra.gmra.mrb[44].mxu0 %vm799_vm2, %v2098_v36 }
 0x525   :  { %v2092_v42 = vpop.f32.mrb[40].mxu1  ;;  %5785 = vmatprep.mubr.msk.bf16.mxu0 %vm6211_vm1, %v6210_v16  ;;  %5782 = vmatpush3.bf16.msra.mxu0 %v6064_v25 }
 0x526   :  { %v2099_v43 = vpack.c.bf16 %v2092_v42, %v2019_v39  ;;  %v5756_v44 = vpop.f32.mrb[41].mxu1  ;;  %5783 = vmatprep.subr.bf16.mxu0 %v6210_v16  ;;  %v5229_v42 = vld [vmem:[%s7179_s8] ss:$0 sm:$0xff] }
 0x528   :  { %5778 = vmatmul.mubr.msk.bf16.vlgmr.msra.gmra.mrb[48].mxu1 %vm799_vm2, %v2099_v43 }
 0x529   :  { %5797 = vmatprep.mubr.msk.bf16.mxu1 %vm6211_vm1, %v6210_v16  ;;  %5784 = vmatpush3.bf16.msra.mxu0 %v6065_v27 }
 0x52a   :  { %5801 = vmatprep.subr.bf16.mxu0 %v6210_v16  ;;  %5790 = vmatpush3.bf16.msra.mxu1 %v6066_v28  ;;  %v5243_v28 = vld [vmem:[%s7201_s30 + $0x1] ss:$0 sm:$0xff] }
 0x52b   :  { %5791 = vmatprep.subr.bf16.mxu1 %v6210_v16 }
 0x52e   :  { %5792 = vmatpush3.bf16.msra.mxu1 %v6067_v29 }
 0x52f   :  { %5793 = vmatprep.subr.bf16.mxu1 %v6210_v16 }
 0x5ef   :  { %v2145_v45 = vpop.f32.mrb[40].mxu0 }
 0x5f0   :  { %v5761_v46 = vpop.f32.mrb[41].mxu0  ;;  %v2293_v50 = vsel %vm67_vm0, %v2145_v45, 0.0 }
 0x5f1   :  { %v2148_v47 = vpop.f32.mrb[42].mxu0 }
 0x5f2   :  { %v5762_v48 = vpop.f32.mrb[43].mxu0  ;;  %v2300_v55 = vsel %vm67_vm0, %v2148_v47, 0.0  ;;  %v5230_v47 = vld [vmem:[%s7180_s9] ss:$0 sm:$0xff] }
 0x5f3   :  { %v2192_v49 = vpop.f32.mrb[44].mxu1 }
 0x5f4   :  { %v2294_v51 = vsel %vm67_vm0, %v2192_v49, 0.0  ;;  %v5767_v52 = vpop.f32.mrb[45].mxu1 }
 0x5f5   :  { %v2295_v53 = vadd.f32 %v2294_v51, %v2293_v50  ;;  %v2195_v54 = vpop.f32.mrb[46].mxu1  ;;  %v6068_v52 = vld [vmem:[%s7183_s12 + $0x10] sm:$0xff]  }
 0x5f6   :  { %v2301_v56 = vsel %vm67_vm0, %v2195_v54, 0.0  ;;  %v5768_v57 = vpop.f32.mrb[47].mxu1  ;;  %5794 = vmatpush3.bf16.msra.mxu1 %v6068_v52  ;;  %v5231_v54 = vld [vmem:[%s7182_s11] ss:$0 sm:$0xff] }
 0x5f7   :  { %v2302_v58 = vadd.f32 %v2301_v56, %v2300_v55  ;;  %v2239_v59 = vpop.f32.mrb[44].mxu0  ;;  %5795 = vmatprep.subr.bf16.mxu1 %v6210_v16  ;;  %v6083_v52 = vld [vmem:[%s7176_s5 + $0x40] sm:$0xff]  }
 0x5f8   :  { %v2296_v60 = vsel %vm67_vm0, %v2239_v59, 0.0  ;;  %v5773_v61 = vpop.f32.mrb[45].mxu0 }
 0x5f9   :  { %v2297_v62 = vadd.f32 %v2296_v60, %v2295_v53  ;;  %v2242_v63 = vpop.f32.mrb[46].mxu0  ;;  %v6069_v53 = vld [vmem:[%s7183_s12 + $0x18] sm:$0xff]  }
 0x5fa   :  { %v2303_v0 = vsel %vm67_vm0, %v2242_v63, 0.0  ;;  %v5774_v1 = vpop.f32.mrb[47].mxu0  ;;  %5796 = vmatpush3.bf16.msra.mxu1 %v6069_v53  ;;  %v6084_v53 = vld [vmem:[%s7175_s4 + $0x58] sm:$0xff]  }
 0x5fb   :  { %v2304_v2 = vadd.f32 %v2303_v0, %v2302_v58  ;;  %v2286_v3 = vpop.f32.mrb[48].mxu1  ;;  %5817 = vmatprep.subr.bf16.mxu1 %v6210_v16  ;;  %v5235_v0 = vld [vmem:[%s7184_s13] ss:$0 sm:$0xff] }
 0x5fc   :  { %v2298_v4 = vsel %vm67_vm0, %v2286_v3, 0.0  ;;  %v5779_v6 = vpop.f32.mrb[49].mxu1 }
 0x5fd   :  { %v2299_v26 = vadd.f32 %v2298_v4, %v2297_v62  ;;  %v2289_v7 = vpop.f32.mrb[50].mxu1 }
 0x5fe   :  { %v2305_v8 = vsel %vm67_vm0, %v2289_v7, 0.0  ;;  %v5780_v30 = vpop.f32.mrb[51].mxu1 }
 0x5ff   :  { %v2314_v33 = vadd.f32 %v5228_v5, %v2299_v26  ;;  %v2306_v9 = vadd.f32 %v2305_v8, %v2304_v2 }
 0x601   :  { %v2315_v10 = vadd.f32 %v5228_v5, %v2306_v9  ;;  %v6669_v34 = vadd.f32 %v6184_v37, %v2314_v33 }
 0x603   :  { %v2320_v38 = vsel %vm67_vm0, %v6669_v34, 0.0  ;;  %v6676_v12 = vadd.f32 %v6185_v11, %v2315_v10 }
 0x604   :  { %2321 = vadd.xlane.f32.xlu0 %v2320_v38 }
 0x605   :  { %v2323_v13 = vsel %vm67_vm0, %v6676_v12, 0.0 }
 0x606   :  { %2324 = vadd.xlane.f32.xlu1 %v2323_v13 }
 0x691   :  { %v2322_v14 = vpop.xlane.xlu0 %2321 }
 0x692   :  { %v2326_v15 = vmul.f32 0.03125, %v2322_v14 }
 0x693   :  { %v2325_v17 = vpop.xlane.xlu1 %2324 }
 0x694   :  { %v2328_v18 = vsub.f32 %v6669_v34, %v2326_v15  ;;  %v2327_v19 = vmul.f32 0.03125, %v2325_v17  ;;  %v6070_v15 = vld [vmem:[%s7200_s23 + $0x40] sm:$0xff]  }
 0x695   :  { %v6071_v17 = vld [vmem:[%s7200_s23 + $0x60] sm:$0xff]  }
 0x696   :  { %v2329_v20 = vsub.f32 %v6676_v12, %v2327_v19  ;;  %v2330_v21 = vmul.f32 %v2328_v18, %v2328_v18  ;;  %v6073_v19 = vld [vmem:[%s7200_s23 + $0x68] sm:$0xff]  }
 0x698   :  { %v2332_v22 = vsel %vm67_vm0, %v2330_v21, 0.0  ;;  %v2331_v23 = vmul.f32 %v2329_v20, %v2329_v20 }
 0x699   :  { %2333 = vadd.xlane.f32.xlu0 %v2332_v22 }
 0x69a   :  { %v2335_v24 = vsel %vm67_vm0, %v2331_v23, 0.0 }
 0x69b   :  { %2336 = vadd.xlane.f32.xlu1 %v2335_v24 }
 0x726   :  { %v2334_v31 = vpop.xlane.xlu0 %2333 }
 0x727   :  { %v2338_v32 = vmul.f32 0.03125, %v2334_v31 }
 0x728   :  { %v2337_v35 = vpop.xlane.xlu1 %2336 }
 0x729   :  { %v2340_v36 = vadd.f32 1e-05, %v2338_v32  ;;  %v2339_v39 = vmul.f32 0.03125, %v2337_v35 }
 0x72b   :  { %6140 = vrsqrt.f32 %v2340_v36  ;;  %v2341_v40 = vadd.f32 1e-05, %v2339_v39  ;;  %v5244_v36 = vld [vmem:[%s7202_s22 + $0x1] ss:$0 sm:$0xff] }
 0x72d   :  { %6142 = vrsqrt.f32 %v2341_v40 }
 0x735   :  { %v6141_v41 = vpop.eup %6140 }
 0x736   :  { %v2344_v43 = vmul.f32 %v6141_v41, %v2328_v18  ;;  %v6072_v18 = vld [vmem:[%s7200_s23 + $0x48] sm:$0xff]  }
 0x737   :  { %v6143_v44 = vpop.eup %6142 }
 0x738   :  { %v2352_v45 = vmul.f32 %v5229_v42, %v2344_v43  ;;  %v2345_v46 = vmul.f32 %v6143_v44, %v2329_v20  ;;  %v6075_v43 = vld [vmem:[%s7175_s4 + $0x40] sm:$0xff]  }
 0x73a   :  { %v2353_v48 = vmul.f32 %v5229_v42, %v2345_v46  ;;  %v2360_v49 = vadd.f32 %v5230_v47, %v2352_v45  ;;  %v6074_v42 = vld [vmem:[%s7200_s23 + $0x50] sm:$0xff]   ;;  %v6076_v45 = vld [vmem:[%s7200_s23 + $0x58] sm:$0xff]   ;;  %v6077_v46 = vld [vmem:[%s7175_s4 + $0x48] sm:$0xff]  }
 0x73c   :  { %v2361_v50 = vadd.f32 %v5230_v47, %v2353_v48  ;;  %v6078_v47 = vld [vmem:[%s7200_s23 + $0x70] sm:$0xff]   ;;  %v6079_v48 = vld [vmem:[%s7175_s4 + $0x60] sm:$0xff]  }
 0x73e   :  { %v2362_v51 = vpack.c.bf16 %v2361_v50, %v2360_v49  ;;  %v6080_v49 = vld [vmem:[%s7200_s23 + $0x78] sm:$0xff]   ;;  %v6081_v50 = vld [vmem:[%s7175_s4 + $0x68] sm:$0xff]  }
 0x740   :  { %5786 = vmatmul.mubr.msk.bf16.vlgmr.msra.gmra.mrb[48].mxu0 %vm67_vm0, %v2362_v51  ;;  %v6082_v51 = vld [vmem:[%s7175_s4 + $0x50] sm:$0xff]  }
 0x741   :  { %5805 = vmatprep.mubr.msk.bf16.mxu0 %vm6211_vm1, %v6210_v16  ;;  %5802 = vmatpush3.bf16.msra.mxu0 %v6070_v15 }
 0x742   :  { %5803 = vmatprep.subr.bf16.mxu0 %v6210_v16 }
 0x745   :  { %5804 = vmatpush3.bf16.msra.mxu0 %v6072_v18 }
 0x746   :  { %5809 = vmatprep.subr.bf16.mxu0 %v6210_v16 }
 0x813   :  { %v2423_v55 = vpop.f32.mrb[48].mxu0 }
 0x814   :  { %v2424_v56 = vadd.f32 %v5231_v54, %v2423_v55  ;;  %v5787_v57 = vpop.f32.mrb[49].mxu0  ;;  %v6086_v55 = vld [vmem:[%s7175_s4 + $0x70] sm:$0xff]  }
 0x815   :  { %v2426_v58 = vpop.f32.mrb[50].mxu0  ;;  %v6088_v57 = vld [vmem:[%s7175_s4 + $0x78] sm:$0xff]   ;;  %s6212_s4 = smov [#allocation2]  }
 0x816   :  { %v2427_v59 = vadd.f32 %v5231_v54, %v2426_v58  ;;  %v5788_v60 = vpop.f32.mrb[51].mxu0  ;;  %v2430_v61 = vmax.f32 %v2424_v56, 0.0  ;;  %v6085_v54 = vld [vmem:[%s7176_s5 + $0x48] sm:$0xff]   ;;  %v6087_v56 = vld [vmem:[%s7176_s5 + $0x60] sm:$0xff]  }
 0x817   :  { %v6089_v58 = vld [vmem:[%s7176_s5 + $0x68] sm:$0xff]   ;;  %v6091_v60 = vld [vmem:[%s7176_s5 + $0x58] sm:$0xff]  }
 0x818   :  { %v2431_v62 = vmax.f32 %v2427_v59, 0.0  ;;  %v6090_v59 = vld [vmem:[%s7176_s5 + $0x50] sm:$0xff]  }
 0x81a   :  { %v2432_v63 = vpack.c.bf16 %v2431_v62, %v2430_v61  ;;  %v6092_v61 = vld [vmem:[%s7176_s5 + $0x70] sm:$0xff]   ;;  %v6093_v62 = vld [vmem:[%s7176_s5 + $0x78] sm:$0xff]  }
 0x81c   :  { %5798 = vmatmul.mubr.msk.bf16.vlgmr.msra.gmra.mrb[52].mxu1 %vm2472_vm4, %v2432_v63 }
 0x81d   :  { %5821 = vmatprep.mubr.msk.bf16.mxu1 %vm6211_vm1, %v6210_v16  ;;  %5818 = vmatpush3.bf16.msra.mxu1 %v6071_v17 }
 0x81e   :  { %5819 = vmatprep.subr.bf16.mxu1 %v6210_v16 }
 0x821   :  { %5820 = vmatpush3.bf16.msra.mxu1 %v6073_v19 }
 0x822   :  { %5833 = vmatprep.subr.bf16.mxu1 %v6210_v16 }
 0x8ef   :  { %v2510_v1 = vpop.f32.mrb[52].mxu1 }
 0x8f0   :  { %v2511_v2 = vadd.f32 %v5235_v0, %v2510_v1  ;;  %v5799_v3 = vpop.f32.mrb[53].mxu1 }
 0x8f1   :  { %v2513_v4 = vpop.f32.mrb[54].mxu1 }
 0x8f2   :  { %v6727_v5 = vadd.f32 %v2511_v2, %v6669_v34  ;;  %v2514_v6 = vadd.f32 %v5235_v0, %v2513_v4  ;;  %v5800_v26 = vpop.f32.mrb[55].mxu1 }
 0x8f4   :  { %v6730_v7 = vadd.f32 %v2514_v6, %v6676_v12  ;;  %v2523_v8 = vsel %vm67_vm0, %v6727_v5, 0.0 }
 0x8f5   :  { %2524 = vadd.xlane.f32.xlu0 %v2523_v8 }
 0x8f6   :  { %v2526_v30 = vsel %vm67_vm0, %v6730_v7, 0.0 }
 0x8f7   :  { %2527 = vadd.xlane.f32.xlu1 %v2526_v30 }
 0x982   :  { %v2525_v33 = vpop.xlane.xlu0 %2524 }
 0x983   :  { %v2529_v9 = vmul.f32 0.03125, %v2525_v33 }
 0x984   :  { %v2528_v10 = vpop.xlane.xlu1 %2527 }
 0x985   :  { %v2531_v37 = vsub.f32 %v6727_v5, %v2529_v9  ;;  %v2530_v34 = vmul.f32 0.03125, %v2528_v10 }
 0x987   :  { %v2532_v38 = vsub.f32 %v6730_v7, %v2530_v34  ;;  %v2533_v11 = vmul.f32 %v2531_v37, %v2531_v37 }
 0x989   :  { %v2535_v12 = vsel %vm67_vm0, %v2533_v11, 0.0  ;;  %v2534_v13 = vmul.f32 %v2532_v38, %v2532_v38 }
 0x98a   :  { %2536 = vadd.xlane.f32.xlu0 %v2535_v12 }
 0x98b   :  { %v2538_v14 = vsel %vm67_vm0, %v2534_v13, 0.0 }
 0x98c   :  { %2539 = vadd.xlane.f32.xlu1 %v2538_v14 }
 0xa17   :  { %v2537_v20 = vpop.xlane.xlu0 %2536 }
 0xa18   :  { %v2541_v21 = vmul.f32 0.03125, %v2537_v20 }
 0xa19   :  { %v2540_v22 = vpop.xlane.xlu1 %2539 }
 0xa1a   :  { %v2543_v23 = vadd.f32 1e-05, %v2541_v21  ;;  %v2542_v24 = vmul.f32 0.03125, %v2540_v22 }
 0xa1c   :  { %6144 = vrsqrt.f32 %v2543_v23  ;;  %v2544_v25 = vadd.f32 1e-05, %v2542_v24 }
 0xa1e   :  { %6146 = vrsqrt.f32 %v2544_v25 }
 0xa26   :  { %v6145_v27 = vpop.eup %6144 }
 0xa27   :  { %v2547_v29 = vmul.f32 %v6145_v27, %v2531_v37 }
 0xa28   :  { %v6147_v31 = vpop.eup %6146 }
 0xa29   :  { %v2555_v32 = vmul.f32 %v5243_v28, %v2547_v29  ;;  %v2548_v35 = vmul.f32 %v6147_v31, %v2532_v38 }
 0xa2b   :  { %v2556_v39 = vmul.f32 %v5243_v28, %v2548_v35  ;;  %v2563_v40 = vadd.f32 %v5244_v36, %v2555_v32 }
 0xa2d   :  { %v2564_v41 = vadd.f32 %v5244_v36, %v2556_v39 }
 0xa2f   :  { %v6768_v44 = vpack.c.bf16 %v2564_v41, %v2563_v40 }
 0xa31   :  { %5806 = vmatmul.mubr.msk.bf16.vlgmr.msra.gmra.mrb[52].mxu0 %vm67_vm0, %v6768_v44  ;;  %5822 = vmatmul.mubr.msk.bf16.vlgmr.msra.gmra.mrb[56].mxu1 %vm67_vm0, %v6768_v44 }
 0xa32   :  { %5810 = vmatpush3.bf16.msra.mxu0 %v6074_v42  ;;  %5834 = vmatpush3.bf16.msra.mxu1 %v6075_v43 }
 0xa33   :  { %5811 = vmatprep.subr.bf16.mxu0 %v6210_v16  ;;  %5835 = vmatprep.subr.bf16.mxu1 %v6210_v16 }
 0xa34   :  { %5813 = vmatprep.mubr.msk.bf16.mxu0 %vm6211_vm1, %v6210_v16  ;;  %5837 = vmatprep.mubr.msk.bf16.mxu1 %vm6211_vm1, %v6210_v16 }
 0xa36   :  { %5812 = vmatpush3.bf16.msra.mxu0 %v6076_v45  ;;  %5836 = vmatpush3.bf16.msra.mxu1 %v6077_v46 }
 0xa37   :  { %5825 = vmatprep.subr.bf16.mxu0 %v6210_v16  ;;  %5849 = vmatprep.subr.bf16.mxu1 %v6210_v16 }
 0xa39   :  { %5814 = vmatmul.mubr.msk.bf16.vlgmr.msra.gmra.mrb[56].mxu0 %vm67_vm0, %v6768_v44  ;;  %5838 = vmatmul.mubr.msk.bf16.vlgmr.msra.gmra.mrb[60].mxu1 %vm67_vm0, %v6768_v44 }
 0xa3a   :  { %5826 = vmatpush3.bf16.msra.mxu0 %v6078_v47  ;;  %5850 = vmatpush3.bf16.msra.mxu1 %v6079_v48 }
 0xa3b   :  { %5827 = vmatprep.subr.bf16.mxu0 %v6210_v16  ;;  %5851 = vmatprep.subr.bf16.mxu1 %v6210_v16 }
 0xa3c   :  { %5829 = vmatprep.mubr.msk.bf16.mxu0 %vm6211_vm1, %v6210_v16  ;;  %5853 = vmatprep.mubr.msk.bf16.mxu1 %vm6211_vm1, %v6210_v16 }
 0xa3e   :  { %5828 = vmatpush3.bf16.msra.mxu0 %v6080_v49  ;;  %5852 = vmatpush3.bf16.msra.mxu1 %v6081_v50 }
 0xa3f   :  { %5841 = vmatprep.subr.bf16.mxu0 %v6210_v16  ;;  %5865 = vmatprep.subr.bf16.mxu1 %v6210_v16 }
 0xa41   :  { %5830 = vmatmul.mubr.msk.bf16.vlgmr.msra.gmra.mrb[60].mxu0 %vm67_vm0, %v6768_v44  ;;  %5854 = vmatmul.mubr.msk.bf16.vlgmr.msra.gmra.mrb[64].mxu1 %vm67_vm0, %v6768_v44 }
 0xa42   :  { %5842 = vmatpush3.bf16.msra.mxu0 %v6082_v51  ;;  %5866 = vmatpush3.bf16.msra.mxu1 %v6083_v52 }
 0xa43   :  { %5843 = vmatprep.subr.bf16.mxu0 %v6210_v16  ;;  %5867 = vmatprep.subr.bf16.mxu1 %v6210_v16 }
 0xa44   :  { %5845 = vmatprep.mubr.msk.bf16.mxu0 %vm6211_vm1, %v6210_v16  ;;  %5869 = vmatprep.mubr.msk.bf16.mxu1 %vm6211_vm1, %v6210_v16 }
 0xa46   :  { %5844 = vmatpush3.bf16.msra.mxu0 %v6084_v53  ;;  %5868 = vmatpush3.bf16.msra.mxu1 %v6085_v54 }
 0xa47   :  { %5857 = vmatprep.subr.bf16.mxu0 %v6210_v16  ;;  %5881 = vmatprep.subr.bf16.mxu1 %v6210_v16 }
 0xa49   :  { %5846 = vmatmul.mubr.msk.bf16.vlgmr.msra.gmra.mrb[64].mxu0 %vm67_vm0, %v6768_v44  ;;  %5870 = vmatmul.mubr.msk.bf16.vlgmr.msra.gmra.mrb[68].mxu1 %vm67_vm0, %v6768_v44 }
 0xa4a   :  { %5858 = vmatpush3.bf16.msra.mxu0 %v6086_v55  ;;  %5882 = vmatpush3.bf16.msra.mxu1 %v6087_v56 }
 0xa4b   :  { %5859 = vmatprep.subr.bf16.mxu0 %v6210_v16  ;;  %5883 = vmatprep.subr.bf16.mxu1 %v6210_v16 }
 0xa4c   :  { %5861 = vmatprep.mubr.msk.bf16.mxu0 %vm6211_vm1, %v6210_v16  ;;  %5885 = vmatprep.mubr.msk.bf16.mxu1 %vm6211_vm1, %v6210_v16 }
 0xa4e   :  { %5860 = vmatpush3.bf16.msra.mxu0 %v6088_v57  ;;  %5884 = vmatpush3.bf16.msra.mxu1 %v6089_v58 }
 0xa4f   :  { %5873 = vmatprep.subr.bf16.mxu0 %v6210_v16  ;;  %5897 = vmatprep.subr.mxu1 %v6210_v16 }
 0xa51   :  { %5862 = vmatmul.mubr.msk.bf16.vlgmr.msra.gmra.mrb[68].mxu0 %vm67_vm0, %v6768_v44  ;;  %5886 = vmatmul.mubr.msk.bf16.vlgmr.msra.gmra.mrb[72].mxu1 %vm67_vm0, %v6768_v44 }
 0xa52   :  { %5874 = vmatpush3.bf16.msra.mxu0 %v6090_v59  ;;  %5877 = vmatprep.mubr.msk.bf16.mxu0 %vm6211_vm1, %v6210_v16 }
 0xa53   :  { %5875 = vmatprep.subr.bf16.mxu0 %v6210_v16  ;;  %5899 = vmatprep.mubr.msk.f32.mxu1 %vm6211_vm1, %v6210_v16 }
 0xa56   :  { %5876 = vmatpush3.bf16.msra.mxu0 %v6091_v60 }
 0xa57   :  { %5889 = vmatprep.subr.bf16.mxu0 %v6210_v16 }
 0xa59   :  { %5878 = vmatmul.mubr.msk.bf16.vlgmr.msra.gmra.mrb[72].mxu0 %vm67_vm0, %v6768_v44 }
 0xa5a   :  { %5890 = vmatpush3.bf16.msra.mxu0 %v6092_v61  ;;  %5893 = vmatprep.mubr.msk.bf16.mxu0 %vm6211_vm1, %v6210_v16 }
 0xa5b   :  { %5891 = vmatprep.subr.bf16.mxu0 %v6210_v16 }
 0xa5e   :  { %5892 = vmatpush3.bf16.msra.mxu0 %v6093_v62 }
 0xa5f   :  { %5907 = vmatprep.subr.mxu0 %v6210_v16 }
 0xa61   :  { %5894 = vmatmul.mubr.msk.bf16.vlgmr.msra.gmra.mrb[76].mxu0 %vm67_vm0, %v6768_v44 }
 0xa62   :  { %5909 = vmatprep.mubr.msk.f32.mxu0 %vm6211_vm1, %v6210_v16 }
 0xb04   :  { %v2632_v63 = vpop.f32.mrb[52].mxu0  ;;  %v2738_v0 = vpop.f32.mrb[56].mxu1 }
 0xb05   :  { %v5807_v1 = vpop.f32.mrb[53].mxu0  ;;  %v5823_v2 = vpop.f32.mrb[57].mxu1 }
 0xb06   :  { %v2635_v3 = vpop.f32.mrb[54].mxu0  ;;  %v2741_v4 = vpop.f32.mrb[58].mxu1 }
 0xb07   :  { %v5808_v6 = vpop.f32.mrb[55].mxu0  ;;  %v5824_v26 = vpop.f32.mrb[59].mxu1 }
 0xb0c   :  { %v2685_v8 = vpop.f32.mrb[56].mxu0  ;;  %v2861_v30 = vpop.f32.mrb[60].mxu1 }
 0xb0d   :  { %v5815_v33 = vpop.f32.mrb[57].mxu0  ;;  %v5839_v9 = vpop.f32.mrb[61].mxu1  ;;  %5898 = vmatpush3.xpose.msk.msra.mxu1 %vm799_vm2, %v2861_v30 }
 0xb0e   :  { %v2688_v10 = vpop.f32.mrb[58].mxu0  ;;  %v2864_v37 = vpop.f32.mrb[62].mxu1  ;;  %5902 = vmatprep.subr.mxu1 %v6210_v16 }
 0xb0f   :  { %v5816_v34 = vpop.f32.mrb[59].mxu0  ;;  %v5840_v38 = vpop.f32.mrb[63].mxu1 }
 0xb10   :  { %5900 = vmatmul.mubr.msk.f32.vlgmr.msra.gmra.mrb[42].mxu1 %vm799_vm2, %v2632_v63 }
 0xb11   :  { %5903 = vmatpush3.xpose.msk.msra.mxu1 %vm799_vm2, %v2864_v37  ;;  %5904 = vmatprep.mubr.msk.f32.mxu1 %vm6211_vm1, %v6210_v16 }
 0xb12   :  { %5912 = vmatprep.subr.mxu1 %v6210_v16 }
 0xb14   :  { %v2791_v11 = vpop.f32.mrb[60].mxu0  ;;  %v2967_v12 = vpop.f32.mrb[64].mxu1  ;;  %5905 = vmatmul.mubr.msk.f32.vlgmr.msra.gmra.mrb[76].mxu1 %vm799_vm2, %v2635_v3 }
 0xb15   :  { %v5831_v13 = vpop.f32.mrb[61].mxu0  ;;  %v5855_v14 = vpop.f32.mrb[65].mxu1  ;;  %5914 = vmatprep.mubr.msk.f32.mxu1 %vm6211_vm1, %v6210_v16 }
 0xb16   :  { %v2794_v15 = vpop.f32.mrb[62].mxu0  ;;  %v2970_v17 = vpop.f32.mrb[66].mxu1 }
 0xb17   :  { %v5832_v18 = vpop.f32.mrb[63].mxu0  ;;  %v5856_v19 = vpop.f32.mrb[67].mxu1 }
 0xb1c   :  { %v2914_v20 = vpop.f32.mrb[64].mxu0  ;;  %v3090_v21 = vpop.f32.mrb[68].mxu1 }
 0xb1d   :  { %v5847_v22 = vpop.f32.mrb[65].mxu0  ;;  %v5871_v23 = vpop.f32.mrb[69].mxu1  ;;  %5908 = vmatpush3.xpose.msk.msra.mxu0 %vm799_vm2, %v2914_v20 }
 0xb1e   :  { %v2917_v24 = vpop.f32.mrb[66].mxu0  ;;  %v3093_v25 = vpop.f32.mrb[70].mxu1  ;;  %5917 = vmatprep.subr.mxu0 %v6210_v16 }
 0xb1f   :  { %v5848_v27 = vpop.f32.mrb[67].mxu0  ;;  %v5872_v28 = vpop.f32.mrb[71].mxu1  ;;  %5913 = vmatpush3.xpose.msk.msra.mxu1 %vm799_vm2, %v2917_v24 }
 0xb20   :  { %5910 = vmatmul.mubr.msk.f32.vlgmr.msra.gmra.mrb[38].mxu0 %vm799_vm2, %v2685_v8  ;;  %5922 = vmatprep.subr.mxu1 %v6210_v16 }
 0xb21   :  { %5918 = vmatpush3.xpose.msk.msra.mxu0 %vm799_vm2, %v2967_v12  ;;  %5919 = vmatprep.mubr.msk.f32.mxu0 %vm6211_vm1, %v6210_v16 }
 0xb22   :  { %5915 = vmatmul.mubr.msk.f32.vlgmr.msra.gmra.mrb[78].mxu1 %vm799_vm2, %v2688_v10  ;;  %5927 = vmatprep.subr.mxu0 %v6210_v16 }
 0xb23   :  { %5923 = vmatpush3.xpose.msk.msra.mxu1 %vm799_vm2, %v2970_v17  ;;  %5924 = vmatprep.mubr.msk.f32.mxu1 %vm6211_vm1, %v6210_v16 }
 0xb24   :  { %v3020_v29 = vpop.f32.mrb[68].mxu0  ;;  %v6915_v31 = vpop.f32.mrb[72].mxu1  ;;  %5920 = vmatmul.mubr.msk.f32.vlgmr.msra.gmra.mrb[80].mxu0 %vm799_vm2, %v2738_v0  ;;  %5932 = vmatprep.subr.mxu1 %v6210_v16 }
 0xb25   :  { %v5863_v32 = vpop.f32.mrb[69].mxu0  ;;  %v5887_v35 = vpop.f32.mrb[73].mxu1  ;;  %5928 = vmatpush3.xpose.msk.msra.mxu0 %vm799_vm2, %v3020_v29  ;;  %5929 = vmatprep.mubr.msk.f32.mxu0 %vm6211_vm1, %v6210_v16 }
 0xb26   :  { %v3023_v36 = vpop.f32.mrb[70].mxu0  ;;  %v6922_v39 = vpop.f32.mrb[74].mxu1  ;;  %5925 = vmatmul.mubr.msk.f32.vlgmr.msra.gmra.mrb[80].mxu1 %vm799_vm2, %v2741_v4  ;;  %5937 = vmatprep.subr.mxu0 %v6210_v16 }
 0xb27   :  { %v5864_v40 = vpop.f32.mrb[71].mxu0  ;;  %v5888_v41 = vpop.f32.mrb[75].mxu1  ;;  %5933 = vmatpush3.xpose.msk.msra.mxu1 %vm799_vm2, %v3023_v36  ;;  %5934 = vmatprep.mubr.msk.f32.mxu1 %vm6211_vm1, %v6210_v16 }
 0xb28   :  { %5930 = vmatmul.mubr.msk.f32.vlgmr.msra.gmra.mrb[82].mxu0 %vm799_vm2, %v2791_v11  ;;  %5942 = vmatprep.subr.mxu1 %v6210_v16 }
 0xb29   :  { %5938 = vmatpush3.msra.mxu0 %v3090_v21  ;;  %5939 = vmatprep.mubr.msk.f32.mxu0 %vm6211_vm1, %v6210_v16 }
 0xb2a   :  { %5935 = vmatmul.mubr.msk.f32.vlgmr.msra.gmra.mrb[82].mxu1 %vm799_vm2, %v2794_v15  ;;  %5947 = vmatprep.subr.mxu0 %v6210_v16 }
 0xb2b   :  { %5943 = vmatpush3.msra.mxu1 %v3093_v25  ;;  %5944 = vmatprep.mubr.msk.f32.mxu1 %vm6211_vm1, %v6210_v16 }
 0xb2c   :  { %v6937_v42 = vpop.f32.mrb[72].mxu0  ;;  %5952 = vmatprep.subr.mxu1 %v6210_v16 }
 0xb2d   :  { %v5879_v43 = vpop.f32.mrb[73].mxu0 }
 0xb2e   :  { %v6940_v44 = vpop.f32.mrb[74].mxu0 }
 0xb2f   :  { %v5880_v45 = vpop.f32.mrb[75].mxu0 }
 0xb34   :  { %v6942_v46 = vpop.f32.mrb[76].mxu0 }
 0xb35   :  { %v5895_v47 = vpop.f32.mrb[77].mxu0 }
 0xb36   :  { %v6944_v48 = vpop.f32.mrb[78].mxu0 }
 0xb37   :  { %v5896_v49 = vpop.f32.mrb[79].mxu0 }
 0xbe3   :  { %v3328_v50 = vpop.f32.mrb[42].mxu1 }
 0xbe4   :  { %v3864_v51 = vmul.f32 0.35355338, %v3328_v50  ;;  %v5901_v52 = vpop.f32.mrb[43].mxu1 }
 0xbe6   :  { %v3872_v53 = vsel %vm799_vm2, %v3864_v51, -inf }
 0xbe7   :  { %3873 = vmax.xlane.f32.xlu0 %v3872_v53  ;;  %v3404_v54 = vpop.f32.mrb[76].mxu1 }
 0xbe8   :  { %v3865_v55 = vmul.f32 0.35355338, %v3404_v54  ;;  %v5906_v56 = vpop.f32.mrb[77].mxu1 }
 0xbea   :  { %v3875_v57 = vsel %vm799_vm2, %v3865_v55, -inf }
 0xbeb   :  { %3876 = vmax.xlane.f32.xlu1 %v3875_v57 }
 0xbf3   :  { %v3480_v58 = vpop.f32.mrb[38].mxu0 }
 0xbf4   :  { %v3866_v59 = vmul.f32 0.35355338, %v3480_v58  ;;  %v5911_v60 = vpop.f32.mrb[39].mxu0 }
 0xbf5   :  { %v3556_v61 = vpop.f32.mrb[78].mxu1 }
 0xbf6   :  { %v3867_v62 = vmul.f32 0.35355338, %v3556_v61  ;;  %v5916_v63 = vpop.f32.mrb[79].mxu1  ;;  %v3878_v0 = vsel %vm799_vm2, %v3866_v59, -inf }
 0xbf7   :  { %3879 = vmax.xlane.f32.xlu0 %v3878_v0  ;;  %v3632_v1 = vpop.f32.mrb[80].mxu0 }
 0xbf8   :  { %v3868_v2 = vmul.f32 0.35355338, %v3632_v1  ;;  %v5921_v3 = vpop.f32.mrb[81].mxu0  ;;  %v3881_v4 = vsel %vm799_vm2, %v3867_v62, -inf }
 0xbf9   :  { %3882 = vmax.xlane.f32.xlu1 %v3881_v4  ;;  %v3708_v6 = vpop.f32.mrb[80].mxu1 }
 0xbfa   :  { %v3869_v26 = vmul.f32 0.35355338, %v3708_v6  ;;  %v5926_v8 = vpop.f32.mrb[81].mxu1  ;;  %v3884_v30 = vsel %vm799_vm2, %v3868_v2, -inf }
 0xbfb   :  { %3885 = vmax.xlane.f32.xlu0 %v3884_v30  ;;  %v3784_v33 = vpop.f32.mrb[82].mxu0 }
 0xbfc   :  { %v3870_v9 = vmul.f32 0.35355338, %v3784_v33  ;;  %v5931_v10 = vpop.f32.mrb[83].mxu0  ;;  %v3887_v37 = vsel %vm799_vm2, %v3869_v26, -inf }
 0xbfd   :  { %3888 = vmax.xlane.f32.xlu1 %v3887_v37  ;;  %v3860_v34 = vpop.f32.mrb[82].mxu1 }
 0xbfe   :  { %v3871_v38 = vmul.f32 0.35355338, %v3860_v34  ;;  %v5936_v11 = vpop.f32.mrb[83].mxu1  ;;  %v3890_v12 = vsel %vm799_vm2, %v3870_v9, -inf }
 0xbff   :  { %3891 = vmax.xlane.f32.xlu0 %v3890_v12 }
 0xc00   :  { %v3893_v13 = vsel %vm799_vm2, %v3871_v38, -inf }
 0xc01   :  { %3894 = vmax.xlane.f32.xlu1 %v3893_v13 }
 0xc74   :  { %v3874_v14 = vpop.xlane.xlu0 %3873 }
 0xc75   :  { %v3896_v15 = vsub.f32 %v3864_v51, %v3874_v14 }
 0xc77   :  { %v3904_v17 = vmul.f32 1.442695, %v3896_v15 }
 0xc78   :  { %v3877_v18 = vpop.xlane.xlu1 %3876 }
 0xc79   :  { %6148 = vpow2.f32 %v3904_v17  ;;  %v3897_v19 = vsub.f32 %v3865_v55, %v3877_v18 }
 0xc7b   :  { %v3906_v20 = vmul.f32 1.442695, %v3897_v19 }
 0xc7d   :  { %6150 = vpow2.f32 %v3906_v20  ;;  %v5362_v20 = vld [vmem:[%s7177_s6 + $0x14] sm:$0xf] }
 0xc83   :  { %v6149_v21 = vpop.eup %6148 }
 0xc84   :  { %v3880_v22 = vpop.xlane.xlu0 %3879  ;;  %v3920_v23 = vsel %vm799_vm2, %v6149_v21, 0.0 }
 0xc85   :  { %v3898_v24 = vsub.f32 %v3866_v59, %v3880_v22  ;;  %3921 = vadd.xlane.f32.xlu0 %v3920_v23 }
 0xc86   :  { %v3883_v25 = vpop.xlane.xlu1 %3882 }
 0xc87   :  { %v6151_v27 = vpop.eup %6150  ;;  %v3908_v28 = vmul.f32 1.442695, %v3898_v24  ;;  %v3899_v29 = vsub.f32 %v3867_v62, %v3883_v25  ;;  %v5363_v24 = vld [vmem:[%s7177_s6 + $0x18] sm:$0xf] }
 0xc88   :  { %v3886_v32 = vpop.xlane.xlu0 %3885  ;;  %v3923_v35 = vsel %vm799_vm2, %v6151_v27, 0.0 }
 0xc89   :  { %6152 = vpow2.f32 %v3908_v28  ;;  %v3910_v36 = vmul.f32 1.442695, %v3899_v29  ;;  %v3900_v40 = vsub.f32 %v3868_v2, %v3886_v32  ;;  %3924 = vadd.xlane.f32.xlu1 %v3923_v35  ;;  %v4660_v29 = vsel %vm2107_vm3, %v5363_v24, 0  ;;  %v5364_v35 = vld [vmem:[%s7177_s6 + $0x1c] sm:$0xf] }
 0xc8a   :  { %v3889_v41 = vpop.xlane.xlu1 %3888 }
 0xc8b   :  { %6154 = vpow2.f32 %v3910_v36  ;;  %v3912_v43 = vmul.f32 1.442695, %v3900_v40  ;;  %v3901_v45 = vsub.f32 %v3869_v26, %v3889_v41 }
 0xc8c   :  { %v3892_v47 = vpop.xlane.xlu0 %3891 }
 0xc8d   :  { %6156 = vpow2.f32 %v3912_v43  ;;  %v3914_v49 = vmul.f32 1.442695, %v3901_v45  ;;  %v3902_v50 = vsub.f32 %v3870_v9, %v3892_v47  ;;  %v4707_v45 = vsel %vm2107_vm3, %v5364_v35, 0  ;;  %v6094_v35 = vld [vmem:[%s7181_s10 + $0x10] sm:$0xff]  }
 0xc8e   :  { %v3895_v51 = vpop.xlane.xlu1 %3894 }
 0xc8f   :  { %6158 = vpow2.f32 %v3914_v49  ;;  %v3916_v52 = vmul.f32 1.442695, %v3902_v50  ;;  %v3903_v53 = vsub.f32 %v3871_v38, %v3895_v51 }
 0xc91   :  { %6160 = vpow2.f32 %v3916_v52  ;;  %v3918_v54 = vmul.f32 1.442695, %v3903_v53 }
 0xc93   :  { %v6153_v55 = vpop.eup %6152  ;;  %6162 = vpow2.f32 %v3918_v54 }
 0xc94   :  { %v3926_v56 = vsel %vm799_vm2, %v6153_v55, 0.0 }
 0xc95   :  { %v6155_v57 = vpop.eup %6154  ;;  %3927 = vadd.xlane.f32.xlu0 %v3926_v56 }
 0xc96   :  { %v3929_v58 = vsel %vm799_vm2, %v6155_v57, 0.0 }
 0xc97   :  { %v6157_v59 = vpop.eup %6156  ;;  %3930 = vadd.xlane.f32.xlu1 %v3929_v58 }
 0xc98   :  { %v3932_v60 = vsel %vm799_vm2, %v6157_v59, 0.0 }
 0xc99   :  { %v6159_v61 = vpop.eup %6158  ;;  %3933 = vadd.xlane.f32.xlu0 %v3932_v60 }
 0xc9a   :  { %v3935_v62 = vsel %vm799_vm2, %v6159_v61, 0.0 }
 0xc9b   :  { %v6161_v63 = vpop.eup %6160  ;;  %3936 = vadd.xlane.f32.xlu1 %v3935_v62 }
 0xc9c   :  { %v3938_v0 = vsel %vm799_vm2, %v6161_v63, 0.0 }
 0xc9d   :  { %v6961_v1 = vpop.eup %6162  ;;  %3939 = vadd.xlane.f32.xlu0 %v3938_v0 }
 0xc9e   :  { %v3941_v2 = vsel %vm799_vm2, %v6961_v1, 0.0 }
 0xc9f   :  { %3942 = vadd.xlane.f32.xlu1 %v3941_v2 }
 0xd12   :  { %v3922_v3 = vpop.xlane.xlu0 %3921 }
 0xd13   :  { %6164 = vrcp.f32 %v3922_v3 }
 0xd16   :  { %v3925_v4 = vpop.xlane.xlu1 %3924 }
 0xd17   :  { %6166 = vrcp.f32 %v3925_v4 }
 0xd1d   :  { %v6165_v6 = vpop.eup %6164 }
 0xd1e   :  { %v3952_v26 = vmul.f32 %v6165_v6, %v6149_v21  ;;  %v4613_v21 = vsel %vm2107_vm3, %v5362_v20, 0 }
 0xd20   :  { %5345 = vst.msk [vmem:[%s7190_s19 + $0x40] sm:$0xff] %vm799_vm2, %v3952_v26  ;;  %5940 = vmatmul.mubr.msk.f32.vlgmr.msra.gmra.mrb[84].mxu0 %vm799_vm2, %v3952_v26 }
 0xd21   :  { %v6167_v8 = vpop.eup %6166  ;;  %5948 = vmatpush3.msra.mxu0 %v6937_v42  ;;  %5949 = vmatprep.mubr.msk.f32.mxu0 %vm6211_vm1, %v6210_v16 }
 0xd22   :  { %v3953_v30 = vmul.f32 %v6167_v8, %v6151_v27  ;;  %v3928_v33 = vpop.xlane.xlu0 %3927  ;;  %5957 = vmatprep.subr.mxu0 %v6210_v16 }
 0xd23   :  { %6168 = vrcp.f32 %v3928_v33 }
 0xd24   :  { %5346 = vst.msk [vmem:[%s7190_s19 + $0x48] sm:$0xff] %vm799_vm2, %v3953_v30  ;;  %5945 = vmatmul.mubr.msk.f32.vlgmr.msra.gmra.mrb[84].mxu1 %vm799_vm2, %v3953_v30  ;;  %v3931_v9 = vpop.xlane.xlu1 %3930 }
 0xd25   :  { %6170 = vrcp.f32 %v3931_v9  ;;  %5953 = vmatpush3.msra.mxu1 %v6940_v44  ;;  %5954 = vmatprep.mubr.msk.f32.mxu1 %vm6211_vm1, %v6210_v16 }
 0xd26   :  { %v3934_v42 = vpop.xlane.xlu0 %3933  ;;  %5962 = vmatprep.subr.mxu1 %v6210_v16 }
 0xd27   :  { %6172 = vrcp.f32 %v3934_v42 }
 0xd28   :  { %v3937_v10 = vpop.xlane.xlu1 %3936 }
 0xd29   :  { %6174 = vrcp.f32 %v3937_v10 }
 0xd2a   :  { %v3940_v37 = vpop.xlane.xlu0 %3939 }
 0xd2b   :  { %6176 = vrcp.f32 %v3940_v37 }
 0xd2c   :  { %v3943_v34 = vpop.xlane.xlu1 %3942 }
 0xd2d   :  { %v6169_v38 = vpop.eup %6168  ;;  %6178 = vrcp.f32 %v3943_v34 }
 0xd2e   :  { %v3954_v11 = vmul.f32 %v6169_v38, %v6153_v55 }
 0xd2f   :  { %v6171_v12 = vpop.eup %6170 }
 0xd30   :  { %5347 = vst.msk [vmem:[%s7190_s19 + $0x50] sm:$0xff] %vm799_vm2, %v3954_v11  ;;  %v3955_v44 = vmul.f32 %v6171_v12, %v6155_v57  ;;  %5950 = vmatmul.mubr.msk.f32.vlgmr.msra.gmra.mrb[86].mxu0 %vm799_vm2, %v3954_v11 }
 0xd31   :  { %v6173_v13 = vpop.eup %6172  ;;  %5958 = vmatpush3.msra.mxu0 %v6915_v31  ;;  %5959 = vmatprep.mubr.msk.f32.mxu0 %vm6211_vm1, %v6210_v16 }
 0xd32   :  { %5348 = vst.msk [vmem:[%s7190_s19 + $0x58] sm:$0xff] %vm799_vm2, %v3955_v44  ;;  %v3956_v14 = vmul.f32 %v6173_v13, %v6157_v59  ;;  %5955 = vmatmul.mubr.msk.f32.vlgmr.msra.gmra.mrb[86].mxu1 %vm799_vm2, %v3955_v44  ;;  %5967 = vmatprep.subr.mxu0 %v6210_v16  ;;  %v5370_v44 = vld [vmem:[%s7178_s7 + $0x1] ss:$0 sm:$0xff] }
 0xd33   :  { %v6175_v15 = vpop.eup %6174  ;;  %5963 = vmatpush3.msra.mxu1 %v6922_v39  ;;  %5964 = vmatprep.mubr.msk.f32.mxu1 %vm6211_vm1, %v6210_v16 }
 0xd34   :  { %5349 = vst.msk [vmem:[%s7190_s19 + $0x60] sm:$0xff] %vm799_vm2, %v3956_v14  ;;  %v3957_v31 = vmul.f32 %v6175_v15, %v6159_v61  ;;  %5960 = vmatmul.mubr.msk.f32.vlgmr.msra.gmra.mrb[88].mxu0 %vm799_vm2, %v3956_v14  ;;  %5972 = vmatprep.subr.mxu1 %v6210_v16 }
 0xd35   :  { %v6177_v17 = vpop.eup %6176  ;;  %5968 = vmatpush3.msra.mxu0 %v6942_v46  ;;  %5969 = vmatprep.mubr.msk.f32.mxu0 %vm6211_vm1, %v6210_v16 }
 0xd36   :  { %5350 = vst.msk [vmem:[%s7190_s19 + $0x68] sm:$0xff] %vm799_vm2, %v3957_v31  ;;  %v3958_v39 = vmul.f32 %v6177_v17, %v6161_v63  ;;  %5965 = vmatmul.mubr.msk.f32.vlgmr.msra.gmra.mrb[88].mxu1 %vm799_vm2, %v3957_v31  ;;  %5977 = vmatprep.subr.bf16.mxu0 %v6210_v16 }
 0xd37   :  { %v6179_v18 = vpop.eup %6178  ;;  %5973 = vmatpush3.msra.mxu1 %v6944_v48  ;;  %5974 = vmatprep.mubr.msk.f32.mxu1 %vm6211_vm1, %v6210_v16  ;;  %v5361_v48 = vld [vmem:[%s7177_s6 + $0x10] sm:$0xf] }
 0xd38   :  { %5351 = vst.msk [vmem:[%s7190_s19 + $0x70] sm:$0xff] %vm799_vm2, %v3958_v39  ;;  %v3959_v46 = vmul.f32 %v6179_v18, %v6961_v1  ;;  %5970 = vmatmul.mubr.msk.f32.vlgmr.msra.gmra.mrb[90].mxu0 %vm799_vm2, %v3958_v39  ;;  %5983 = vmatprep.subr.bf16.mxu1 %v6210_v16  ;;  %v4566_v19 = vsel %vm2107_vm3, %v5361_v48, 0 }
 0xd39   :  { %5979 = vmatprep.mubr.msk.bf16.mxu0 %vm6211_vm1, %v6210_v16  ;;  %5978 = vmatpush3.bf16.msra.mxu0 %v4566_v19 }
 0xd3a   :  { %5352 = vst.msk [vmem:[%s7190_s19 + $0x78] sm:$0xff] %vm799_vm2, %v3959_v46  ;;  %5975 = vmatmul.mubr.msk.f32.vlgmr.msra.gmra.mrb[90].mxu1 %vm799_vm2, %v3959_v46  ;;  %5989 = vmatprep.subr.bf16.mxu0 %v6210_v16 }
 0xd3b   :  { %5985 = vmatprep.mubr.msk.bf16.mxu1 %vm6211_vm1, %v6210_v16  ;;  %5984 = vmatpush3.bf16.msra.mxu1 %v4613_v21 }
 0xd3c   :  { %5995 = vmatprep.subr.bf16.mxu1 %v6210_v16 }
 0xdf3   :  { %v4038_v22 = vpop.f32.mrb[84].mxu0 }
 0xdf4   :  { %v5941_v23 = vpop.f32.mrb[85].mxu0 }
 0xdf7   :  { %v4111_v25 = vpop.f32.mrb[84].mxu1 }
 0xdf8   :  { %v4553_v27 = vpack.c.bf16 %v4111_v25, %v4038_v22  ;;  %v5946_v28 = vpop.f32.mrb[85].mxu1 }
 0xdfa   :  { %5980 = vmatmul.mubr.msk.bf16.vlgmr.msra.gmra.mrb[92].mxu0 %vm799_vm2, %v4553_v27 }
 0xdfb   :  { %5990 = vmatpush3.bf16.msra.mxu0 %v4660_v29  ;;  %5991 = vmatprep.mubr.msk.bf16.mxu0 %vm6211_vm1, %v6210_v16 }
 0xdfc   :  { %6001 = vmatprep.subr.bf16.mxu0 %v6210_v16 }
 0xe03   :  { %v4184_v32 = vpop.f32.mrb[86].mxu0 }
 0xe04   :  { %v5951_v36 = vpop.f32.mrb[87].mxu0 }
 0xe05   :  { %v4257_v40 = vpop.f32.mrb[86].mxu1  ;;  %v6095_v36 = vld [vmem:[%s7181_s10 + $0x18] sm:$0xff]  }
 0xe06   :  { %v4554_v41 = vpack.c.bf16 %v4257_v40, %v4184_v32  ;;  %v5956_v43 = vpop.f32.mrb[87].mxu1  ;;  %v6096_v40 = vld [vmem:[%s7183_s12 + $0x20] sm:$0xff]  }
 0xe07   :  { %v4330_v47 = vpop.f32.mrb[88].mxu0 }
 0xe08   :  { %v5961_v49 = vpop.f32.mrb[89].mxu0  ;;  %5986 = vmatmul.mubr.msk.bf16.vlgmr.msra.gmra.mrb[92].mxu1 %vm799_vm2, %v4554_v41  ;;  %v6097_v41 = vld [vmem:[%s7183_s12 + $0x28] sm:$0xff]  }
 0xe09   :  { %v4403_v50 = vpop.f32.mrb[88].mxu1  ;;  %5996 = vmatpush3.bf16.msra.mxu1 %v4707_v45  ;;  %5997 = vmatprep.mubr.msk.bf16.mxu1 %vm6211_vm1, %v6210_v16 }
 0xe0a   :  { %v4555_v51 = vpack.c.bf16 %v4403_v50, %v4330_v47  ;;  %v5966_v52 = vpop.f32.mrb[89].mxu1  ;;  %6009 = vmatprep.subr.bf16.mxu1 %v6210_v16 }
 0xe0b   :  { %v4476_v53 = vpop.f32.mrb[90].mxu0 }
 0xe0c   :  { %v5971_v54 = vpop.f32.mrb[91].mxu0  ;;  %5992 = vmatmul.mubr.msk.bf16.vlgmr.msra.gmra.mrb[96].mxu0 %vm799_vm2, %v4555_v51 }
 0xe0d   :  { %v4549_v55 = vpop.f32.mrb[90].mxu1  ;;  %6005 = vmatprep.mubr.msk.bf16.mxu0 %vm6211_vm1, %v6210_v16  ;;  %6002 = vmatpush3.bf16.msra.mxu0 %v6094_v35 }
 0xe0e   :  { %v4556_v56 = vpack.c.bf16 %v4549_v55, %v4476_v53  ;;  %v5976_v57 = vpop.f32.mrb[91].mxu1  ;;  %6003 = vmatprep.subr.bf16.mxu0 %v6210_v16  ;;  %v5373_v53 = vld [vmem:[%s7179_s8 + $0x1] ss:$0 sm:$0xff] }
 0xe10   :  { %5998 = vmatmul.mubr.msk.bf16.vlgmr.msra.gmra.mrb[96].mxu1 %vm799_vm2, %v4556_v56 }
 0xe11   :  { %6017 = vmatprep.mubr.msk.bf16.mxu1 %vm6211_vm1, %v6210_v16  ;;  %6004 = vmatpush3.bf16.msra.mxu0 %v6095_v36 }
 0xe12   :  { %6021 = vmatprep.subr.bf16.mxu0 %v6210_v16  ;;  %6010 = vmatpush3.bf16.msra.mxu1 %v6096_v40 }
 0xe13   :  { %6011 = vmatprep.subr.bf16.mxu1 %v6210_v16 }
 0xe16   :  { %6012 = vmatpush3.bf16.msra.mxu1 %v6097_v41  ;;  %v6102_v41 = vld [vmem:[%s7187_s16] sm:$0xff]  }
 0xe17   :  { %6013 = vmatprep.subr.bf16.mxu1 %v6210_v16 }
 0xecd   :  { %v4602_v58 = vpop.f32.mrb[92].mxu0 }
 0xece   :  { %v5981_v59 = vpop.f32.mrb[93].mxu0  ;;  %v4750_v63 = vsel %vm67_vm0, %v4602_v58, 0.0  ;;  %v5374_v58 = vld [vmem:[%s7180_s9 + $0x1] ss:$0 sm:$0xff] }
 0xecf   :  { %v4605_v60 = vpop.f32.mrb[94].mxu0 }
 0xed0   :  { %v5982_v61 = vpop.f32.mrb[95].mxu0  ;;  %v4757_v4 = vsel %vm67_vm0, %v4605_v60, 0.0 }
 0xedb   :  { %v4649_v62 = vpop.f32.mrb[92].mxu1 }
 0xedc   :  { %v4751_v0 = vsel %vm67_vm0, %v4649_v62, 0.0  ;;  %v5987_v1 = vpop.f32.mrb[93].mxu1 }
 0xedd   :  { %v4752_v2 = vadd.f32 %v4751_v0, %v4750_v63  ;;  %v4652_v3 = vpop.f32.mrb[94].mxu1  ;;  %v6098_v63 = vld [vmem:[%s7183_s12 + $0x30] sm:$0xff]   ;;  %v6099_v0 = vld [vmem:[%s7183_s12 + $0x38] sm:$0xff]   ;;  %v5380_v1 = vld [vmem:[%s7182_s11 + $0x1] ss:$0 sm:$0xff] }
 0xede   :  { %v4758_v6 = vsel %vm67_vm0, %v4652_v3, 0.0  ;;  %v5988_v26 = vpop.f32.mrb[95].mxu1  ;;  %6014 = vmatpush3.bf16.msra.mxu1 %v6098_v63 }
 0xedf   :  { %v4759_v8 = vadd.f32 %v4758_v6, %v4757_v4  ;;  %v4696_v30 = vpop.f32.mrb[96].mxu0  ;;  %6015 = vmatprep.subr.bf16.mxu1 %v6210_v16 }
 0xee0   :  { %v4753_v33 = vsel %vm67_vm0, %v4696_v30, 0.0  ;;  %v5993_v9 = vpop.f32.mrb[97].mxu0 }
 0xee1   :  { %v4754_v42 = vadd.f32 %v4753_v33, %v4752_v2  ;;  %v4699_v10 = vpop.f32.mrb[98].mxu0 }
 0xee2   :  { %v4760_v37 = vsel %vm67_vm0, %v4699_v10, 0.0  ;;  %v5994_v34 = vpop.f32.mrb[99].mxu0  ;;  %6016 = vmatpush3.bf16.msra.mxu1 %v6099_v0  ;;  %v6101_v10 = vld [vmem:[%s7185_s14 + $0x8] sm:$0xff]  }
 0xee3   :  { %v4761_v38 = vadd.f32 %v4760_v37, %v4759_v8  ;;  %v4743_v11 = vpop.f32.mrb[96].mxu1  ;;  %v5393_v37 = vld [vmem:[%s7184_s13 + $0x1] ss:$0 sm:$0xff] }
 0xee4   :  { %v4755_v12 = vsel %vm67_vm0, %v4743_v11, 0.0  ;;  %v5999_v13 = vpop.f32.mrb[97].mxu1 }
 0xee5   :  { %v4756_v14 = vadd.f32 %v4755_v12, %v4754_v42  ;;  %v4746_v15 = vpop.f32.mrb[98].mxu1  ;;  %v6100_v42 = vld [vmem:[%s7185_s14] sm:$0xff]  }
 0xee6   :  { %v4762_v31 = vsel %vm67_vm0, %v4746_v15, 0.0  ;;  %v6000_v17 = vpop.f32.mrb[99].mxu1 }
 0xee7   :  { %v4772_v39 = vadd.f32 %v5370_v44, %v4756_v14  ;;  %v4763_v18 = vadd.f32 %v4762_v31, %v4761_v38 }
 0xee9   :  { %v4773_v46 = vadd.f32 %v5370_v44, %v4763_v18  ;;  %v7078_v48 = vadd.f32 %v4772_v39, %v6727_v5 }
 0xeeb   :  { %v4780_v19 = vsel %vm67_vm0, %v7078_v48, 0.0  ;;  %v7083_v20 = vadd.f32 %v4773_v46, %v6730_v7 }
 0xeec   :  { %4781 = vadd.xlane.f32.xlu0 %v4780_v19 }
 0xeed   :  { %v4783_v21 = vsel %vm67_vm0, %v7083_v20, 0.0 }
 0xeee   :  { %4784 = vadd.xlane.f32.xlu1 %v4783_v21 }
 0xf79   :  { %v4782_v22 = vpop.xlane.xlu0 %4781 }
 0xf7a   :  { %v4786_v23 = vmul.f32 0.03125, %v4782_v22 }
 0xf7b   :  { %v4785_v24 = vpop.xlane.xlu1 %4784 }
 0xf7c   :  { %v4788_v25 = vsub.f32 %v7078_v48, %v4786_v23  ;;  %v4787_v27 = vmul.f32 0.03125, %v4785_v24 }
 0xf7e   :  { %v4789_v5 = vsub.f32 %v7083_v20, %v4787_v27  ;;  %v4790_v28 = vmul.f32 %v4788_v25, %v4788_v25 }
 0xf80   :  { %v4792_v29 = vsel %vm67_vm0, %v4790_v28, 0.0  ;;  %v4791_v32 = vmul.f32 %v4789_v5, %v4789_v5 }
 0xf81   :  { %4793 = vadd.xlane.f32.xlu0 %v4792_v29 }
 0xf82   :  { %v4795_v7 = vsel %vm67_vm0, %v4791_v32, 0.0 }
 0xf83   :  { %4796 = vadd.xlane.f32.xlu1 %v4795_v7 }
0x100e   :  { %v4794_v43 = vpop.xlane.xlu0 %4793 }
0x100f   :  { %v4798_v45 = vmul.f32 0.03125, %v4794_v43  ;;  %v6103_v43 = vld [vmem:[%s7187_s16 + $0x8] sm:$0xff]   ;;  %s5150_s16 = sshll.u32 %s6212_s4, 4  ;;  %s5151_s16 = int_to_ptr.vmem [resolvable:$true] %s5150_s16 }
0x1010   :  { %v4797_v47 = vpop.xlane.xlu1 %4796  ;;  %p6191_p1 = scmp.lt.s32.totalorder %s5151_s16, %s5151_s16 }
0x1011   :  { %v4800_v49 = vadd.f32 1e-05, %v4798_v45  ;;  %v4799_v50 = vmul.f32 0.03125, %v4797_v47  ;;  %v5399_v45 = vld [vmem:[%s7186_s15] ss:$0 sm:$0xff]  ;;  %s6186_s15 = scalar_lea.vmem %s5151_s16, 32 }
0x1012   :  { %p6187_p0 = scmp.ne.s32.totalorder %s5151_s16, %s6186_s15  ;;  %p6192_p2 = scmp.lt.s32.totalorder %s6186_s15, %s6186_s15 }
0x1013   :  { %6180 = vrsqrt.f32 %v4800_v49  ;;  %v4801_v51 = vadd.f32 1e-05, %v4799_v50 }
0x1014   :  { %p6193_p3 = por %p6192_p2, %p6191_p1 }
0x1015   :  { %6182 = vrsqrt.f32 %v4801_v51 }
0x1016   :  { %p6194_p4 = pnand %p6193_p3, %p6187_p0 }
0x101d   :  { %v6181_v52 = vpop.eup %6180 }
0x101e   :  { %v4804_v54 = vmul.f32 %v6181_v52, %v4788_v25 }
0x101f   :  { %v6183_v55 = vpop.eup %6182 }
0x1020   :  { %v4812_v56 = vmul.f32 %v5373_v53, %v4804_v54  ;;  %v4805_v57 = vmul.f32 %v6183_v55, %v4789_v5 }
0x1022   :  { %v4813_v59 = vmul.f32 %v5373_v53, %v4805_v57  ;;  %v4820_v60 = vadd.f32 %v5374_v58, %v4812_v56 }
0x1024   :  { %v4821_v61 = vadd.f32 %v5374_v58, %v4813_v59 }
0x1026   :  { %v4822_v62 = vpack.c.bf16 %v4821_v61, %v4820_v60 }
0x1028   :  { %6006 = vmatmul.mubr.msk.bf16.vlgmr.msra.gmra.mrb[100].mxu0 %vm67_vm0, %v4822_v62 }
0x1029   :  { %6025 = vmatprep.mubr.msk.bf16.mxu0 %vm6211_vm1, %v6210_v16  ;;  %6022 = vmatpush3.bf16.msra.mxu0 %v6100_v42 }
0x102a   :  { %6023 = vmatprep.subr.bf16.mxu0 %v6210_v16 }
0x102d   :  { %6024 = vmatpush3.bf16.msra.mxu0 %v6101_v10 }
0x102e   :  { %6029 = vmatprep.subr.bf16.mxu0 %v6210_v16 }
0x10fb   :  { %v4885_v2 = vpop.f32.mrb[100].mxu0 }
0x10fc   :  { %v4886_v3 = vadd.f32 %v5380_v1, %v4885_v2  ;;  %v6007_v4 = vpop.f32.mrb[101].mxu0 }
0x10fd   :  { %v4888_v6 = vpop.f32.mrb[102].mxu0 }
0x10fe   :  { %v4889_v26 = vadd.f32 %v5380_v1, %v4888_v6  ;;  %v6008_v8 = vpop.f32.mrb[103].mxu0  ;;  %v4892_v30 = vmax.f32 %v4886_v3, 0.0 }
0x1100   :  { %v4893_v33 = vmax.f32 %v4889_v26, 0.0 }
0x1102   :  { %v4894_v9 = vpack.c.bf16 %v4893_v33, %v4892_v30 }
0x1104   :  { %6018 = vmatmul.mubr.msk.bf16.vlgmr.msra.gmra.mrb[100].mxu1 %vm2472_vm4, %v4894_v9 }
0x11d7   :  { %v4973_v34 = vpop.f32.mrb[100].mxu1 }
0x11d8   :  { %v4974_v38 = vadd.f32 %v5393_v37, %v4973_v34  ;;  %v6019_v11 = vpop.f32.mrb[101].mxu1 }
0x11d9   :  { %v4976_v12 = vpop.f32.mrb[102].mxu1 }
0x11da   :  { %v4980_v44 = vadd.f32 %v4974_v38, %v7078_v48  ;;  %v4977_v13 = vadd.f32 %v5393_v37, %v4976_v12  ;;  %v6020_v14 = vpop.f32.mrb[103].mxu1 }
0x11dc   :  { %v4982_v15 = vsel %vm67_vm0, %v4980_v44, 0.0  ;;  %v4981_v31 = vadd.f32 %v4977_v13, %v7083_v20 }
0x11dd   :  { %v4983_v17 = vrot.slane %v4982_v15, 4 }
0x11de   :  { %v4989_v39 = vsel %vm67_vm0, %v4981_v31, 0.0 }
0x11df   :  { %v4984_v18 = vadd.f32 %v4983_v17, %v4982_v15  ;;  %v4990_v46 = vrot.slane %v4989_v39, 4 }
0x11e1   :  { %v4985_v19 = vrot.slane %v4984_v18, 2  ;;  %v4991_v21 = vadd.f32 %v4990_v46, %v4989_v39 }
0x11e3   :  { %v4986_v22 = vadd.f32 %v4985_v19, %v4984_v18  ;;  %v4992_v23 = vrot.slane %v4991_v21, 2 }
0x11e5   :  { %v4987_v24 = vrot.slane %v4986_v22, 1  ;;  %v4993_v25 = vadd.f32 %v4992_v23, %v4991_v21 }
0x11e7   :  { %v4988_v27 = vadd.f32 %v4987_v24, %v4986_v22  ;;  %v4994_v5 = vrot.slane %v4993_v25, 1 }
0x11e9   :  { %v4997_v48 = vmul.f32 0.125, %v4988_v27  ;;  %v4995_v28 = vadd.f32 %v4994_v5, %v4993_v25 }
0x11eb   :  { %v4999_v29 = vpack.c.bf16 %v4997_v48, %v4997_v48  ;;  %v4998_v32 = vmul.f32 0.125, %v4995_v28 }
0x11ed   :  { %v5000_v7 = vpack.c.bf16 %v4998_v32, %v4998_v32  ;;  %v5014_v20 = vunpack.c.l.b16 %v4999_v29 }
0x11ef   :  { %v5015_v35 = vunpack.c.l.b16 %v5000_v7 }
0x11f1   :  { %v5017_v36 = vsel %vm5016_vm5, %v5015_v35, %v5014_v20 }
0x11f2   :  { %v5018_v40 = vpack.c.b16 %v5017_v36, %v5017_v36 }
0x11f4   :  { %6026 = vmatmul.mubr.msk.bf16.vlgmr.msra.gmra.mrb[104].mxu0 %vm67_vm0, %v5018_v40 }
0x11f5   :  { %6033 = vmatprep.mubr.msk.bf16.mxu0 %vm6211_vm1, %v6210_v16  ;;  %6030 = vmatpush3.bf16.msra.mxu0 %v6102_v41 }
0x11f6   :  { %6031 = vmatprep.subr.bf16.mxu0 %v6210_v16  ;;  %v5403_v16 = vld [vmem:[%s7188_s17] ss:$0 sm:$0xff] }
0x11f9   :  { %6032 = vmatpush3.bf16.msra.mxu0 %v6103_v43 }
0x12c7   :  { %v5068_v47 = vpop.f32.mrb[104].mxu0 }
0x12c8   :  { %v5069_v49 = vadd.f32 %v5399_v45, %v5068_v47  ;;  %v6027_v50 = vpop.f32.mrb[105].mxu0 }
0x12c9   :  { %v5071_v51 = vpop.f32.mrb[106].mxu0 }
0x12ca   :  { %v5074_v52 = vmax.f32 %v5069_v49, 0.0  ;;  %v6028_v53 = vpop.f32.mrb[107].mxu0 }
0x12cc   :  { %v5075_v54 = vpack.c.bf16 %v5074_v52, %v5074_v52 }
0x12ce   :  { %6034 = vmatmul.mubr.msk.bf16.vlgmr.msra.gmra.mrb[108].mxu0 %vm67_vm0, %v5075_v54 }
0x13a1   :  { %v5136_v55 = vpop.f32.mrb[108].mxu0 }
0x13a2   :  { %v5137_v56 = vadd.f32 %v5403_v16, %v5136_v55  ;;  %v6035_v57 = vpop.f32.mrb[109].mxu0 }
0x13a3   :  { %v5139_v58 = vpop.f32.mrb[110].mxu0 }
0x13a4   :  { %v6036_v59 = vpop.f32.mrb[111].mxu0  ;;  %5143 = vst.msk [vmem:[#allocation2] sm:$0x3] %vm5142_vm6, %v5137_v56 }
0x13a5   :  { %6197 = shalt.err (!%p6194_p4)
}
0x13a6   :  { %s6198_s17 = scalar_lea.hbm %s7189_s18, 32 }
0x13a7   :  { %p6199_p5 = scmp.ne.s32.totalorder %s7189_s18, %s6198_s17  ;;  %p6202_p6 = scmp.lt.u32.totalorder %s6198_s17, %s7189_s18 }
0x13a9   :  { %p6204_p7 = pnand %p6202_p6, %p6199_p5 }
0x13ab   :  { %6207 = shalt.err (!%p6204_p7)
}
0x13ac   :  { %5153 = dma.vmem_to_hbm [thread:$0]  %s5151_s16, 32, %s7189_s18, [#allocation3]  }
0x13ad   :  { %6208 = dma.done.wait [#allocation3], 32  }
0x13ae   :  { %6209 = vsyncadd [#allocation3], 4294967264 }
0x13af   :  { %5161 = vsyncpa [#allocation3], 1 }

</bundles_post_ra>
